<compile_context>
chip_gen: v6e
topology: v6e:2x2x1
jax: 0.10.0
libtpu: 0.0.40
codegen_flags: <defaults>
</compile_context>

<pallas_src>
import jax
import jax.numpy as jnp
from jax.experimental import pallas as pl
from jax.experimental.pallas import tpu as pltpu


def _round_up(x, m):
    return (x + m - 1) // m * m


def _batch_tile():
    """128-row tiles for v5e (4x128x128 MXU); 256 fills v6e/v7x (2x256x256)."""
    try:
        kind = jax.devices()[0].device_kind.lower()
    except Exception:
        return 128
    if "v6" in kind or "v7" in kind:
        return 256
    return 128


def _ae_kernel(xm_ref, we_ref, be_ref, wd_ref, bd_ref, z_ref, y_ref):
    """Fused encode + decode for one batch tile.

    xm_ref : [TB, DMp]  bf16   [flatten(x) | meta], zero-padded
    we_ref : [DMp, Kp]  bf16   stacked encoder weight [Wex ; Wem], zero-padded
    be_ref : [1, Kp]    f32    encoder bias
    wd_ref : [Kp, Dp]   bf16   decoder weight, zero-padded
    bd_ref : [1, Dp]    f32    decoder bias
    z_ref  : [TB, Kp]   f32    latent (lane-dense, padded)
    y_ref  : [TB, Dp]   f32    reconstruction (lane-dense, flat)
    """
    # encode: single fused contraction over [x | meta], f32 accumulation
    z = jnp.dot(xm_ref[...], we_ref[...], preferred_element_type=jnp.float32)
    z = jnp.maximum(z + be_ref[...], 0.0)
    z_ref[...] = z.astype(z_ref.dtype)

    # decode: bf16 MXU matmul, f32 accumulation
    y = jnp.dot(z.astype(wd_ref.dtype), wd_ref[...],
                preferred_element_type=jnp.float32)
    y_ref[...] = (y + bd_ref[...]).astype(y_ref.dtype)


def base_ae_forward(x_nchw, meta, params, *, batch_tile=None):
    """Fused autoencoder forward.  Returns (recon_nchw, latent)."""
    B, C, H, W = x_nchw.shape
    D = C * H * W
    M = meta.shape[1]
    K = params["wd"].shape[0]

    TB = batch_tile or _batch_tile()
    DMp = _round_up(D + M, 128)          # fused contraction dim, lane-aligned
    Kp = _round_up(max(K, 128), 128)     # lane-dense latent
    Dp = _round_up(D, 128)               # lane-dense recon
    Bp = _round_up(B, TB)

    cdt = jnp.bfloat16

    # --- trace-time prep: fuse meta branch, pad, cast to bf16 ---------------
    xm = jnp.concatenate([x_nchw.reshape(B, D), meta], axis=1)      # [B, D+M]
    xm = jnp.zeros((Bp, DMp), cdt).at[:B, :D + M].set(xm.astype(cdt))

    we = jnp.concatenate([params["wex"], params["wem"]], axis=0)    # [D+M, K]
    we = jnp.zeros((DMp, Kp), cdt).at[:D + M, :K].set(we.astype(cdt))
    be = jnp.zeros((1, Kp), jnp.float32).at[:, :K].set(params["be"])
    wd = jnp.zeros((Kp, Dp), cdt).at[:K, :D].set(params["wd"].astype(cdt))
    bd = jnp.zeros((1, Dp), jnp.float32).at[:, :D].set(params["bd"])

    grid = (Bp // TB,)

    flops = 2 * Bp * DMp * Kp + 2 * Bp * Kp * Dp
    bytes_accessed = (
        xm.size * 2 + we.size * 2 + wd.size * 2 +      # bf16 inputs
        be.size * 4 + bd.size * 4 +                    # f32 biases
        Bp * Kp * 4 + Bp * Dp * 4                      # f32 outputs
    )

    z_pad, y_pad = pl.pallas_call(
        _ae_kernel,
        out_shape=(
            jax.ShapeDtypeStruct((Bp, Kp), jnp.float32),
            jax.ShapeDtypeStruct((Bp, Dp), jnp.float32),
        ),
        grid=grid,
        in_specs=[
            pl.BlockSpec((TB, DMp), lambda i: (i, 0)),   # activations: per tile
            pl.BlockSpec((DMp, Kp), lambda i: (0, 0)),   # We: VMEM-resident
            pl.BlockSpec((1, Kp), lambda i: (0, 0)),     # b_e
            pl.BlockSpec((Kp, Dp), lambda i: (0, 0)),    # Wd: VMEM-resident
            pl.BlockSpec((1, Dp), lambda i: (0, 0)),     # b_d
        ],
        out_specs=(
            pl.BlockSpec((TB, Kp), lambda i: (i, 0)),    # latent
            pl.BlockSpec((TB, Dp), lambda i: (i, 0)),    # recon (flat)
        ),
        compiler_params=pltpu.CompilerParams(
            dimension_semantics=("parallel",),           # megacore on v7x
            vmem_limit_bytes=48 << 20,                   # < v7x 64 MiB physical
        ),
        cost_estimate=pl.CostEstimate(
            flops=flops, transcendentals=0, bytes_accessed=bytes_accessed),
    )(xm, we, be, wd, bd)

    latent = z_pad[:B, :K]
    recon = y_pad[:B, :D].reshape(B, C, H, W)
    return recon, latent


def init_params(key, D, M, K):
    """Deterministic synthetic parameter init (no checkpoint loading)."""
    k1, k2, k3 = jax.random.split(key, 3)
    scale_e = 1.0 / jnp.sqrt(jnp.float32(D + M))
    scale_d = 1.0 / jnp.sqrt(jnp.float32(K))
    return {
        "wex": jax.random.normal(k1, (D, K), jnp.float32) * scale_e,
        "wem": jax.random.normal(k2, (M, K), jnp.float32) * scale_e,
        "be": jnp.zeros((1, K), jnp.float32),
        "wd": jax.random.normal(k3, (K, D), jnp.float32) * scale_d,
        "bd": jnp.zeros((1, D), jnp.float32),
    }


if __name__ == "__main__":
    # Small shapes consistent with an image autoencoder interface.
    B, C, H, W = 2, 4, 16, 16          # NCHW input
    M = 8                              # meta features per example
    K = 32                             # latent dim
    D = C * H * W

    key = jax.random.PRNGKey(0)
    kx, km, kp = jax.random.split(key, 3)
    x = jax.random.normal(kx, (B, C, H, W), jnp.float32)
    meta = jax.random.normal(km, (B, M), jnp.float32)
    params = init_params(kp, D, M, K)

    recon, latent = base_ae_forward(x, meta, params)
    jax.block_until_ready((recon, latent))

    # Reference with the same bf16-weight / f32-accumulate quantization path.
    xm_r = jnp.concatenate([x.reshape(B, D), meta], 1).astype(jnp.bfloat16)
    we_r = jnp.concatenate([params["wex"], params["wem"]], 0).astype(jnp.bfloat16)
    z_exp = jnp.maximum(
        jnp.dot(xm_r, we_r, preferred_element_type=jnp.float32) + params["be"],
        0.0)
    y_exp = (jnp.dot(z_exp.astype(jnp.bfloat16),
                     params["wd"].astype(jnp.bfloat16),
                     preferred_element_type=jnp.float32)
             + params["bd"]).reshape(B, C, H, W)

    assert recon.shape == (B, C, H, W)
    assert latent.shape == (B, K)
    assert jnp.allclose(latent, z_exp, atol=1e-2, rtol=1e-2)
    assert jnp.allclose(recon, y_exp, atol=1e-2, rtol=1e-2)

    print("KERNEL_OK")
</pallas_src>

<mosaic_0001>
module attributes {stable_mosaic.version = 11 : i64} {
  func.func @_ae_kernel(%arg0: i32, %arg1: memref<128x1152xbf16, #tpu.memory_space<vmem>>, %arg2: memref<1152x128xbf16, #tpu.memory_space<vmem>>, %arg3: memref<1x128xf32, #tpu.memory_space<vmem>>, %arg4: memref<128x1024xbf16, #tpu.memory_space<vmem>>, %arg5: memref<1x1024xf32, #tpu.memory_space<vmem>>, %arg6: memref<128x128xf32, #tpu.memory_space<vmem>>, %arg7: memref<128x1024xf32, #tpu.memory_space<vmem>>) attributes {dimension_semantics = [#tpu.dimension_semantics<parallel>], iteration_bounds = array<i64: 1>, scalar_prefetch = 0 : i64, scratch_operands = 0 : i64, tpu.core_type = #tpu.core_type<tc>, window_params = [{transform_indices = @transform_0, window_bounds = array<i64: 128, 1152>}, {pipeline_mode = #tpu.pipeline_mode<synchronous>, transform_indices = @transform_1, window_bounds = array<i64: 1152, 128>}, {pipeline_mode = #tpu.pipeline_mode<synchronous>, transform_indices = @transform_2, window_bounds = array<i64: 1, 128>}, {pipeline_mode = #tpu.pipeline_mode<synchronous>, transform_indices = @transform_3, window_bounds = array<i64: 128, 1024>}, {pipeline_mode = #tpu.pipeline_mode<synchronous>, transform_indices = @transform_4, window_bounds = array<i64: 1, 1024>}, {transform_indices = @transform_5, window_bounds = array<i64: 128, 128>}, {transform_indices = @transform_6, window_bounds = array<i64: 128, 1024>}]} {
    %c0 = arith.constant 0 : index
    %c0_0 = arith.constant 0 : index
    %0 = vector.load %arg1[%c0, %c0_0] : memref<128x1152xbf16, #tpu.memory_space<vmem>>, vector<128x1152xbf16>
    %c0_1 = arith.constant 0 : index
    %c0_2 = arith.constant 0 : index
    %1 = vector.load %arg2[%c0_1, %c0_2] : memref<1152x128xbf16, #tpu.memory_space<vmem>>, vector<1152x128xbf16>
    %cst = arith.constant dense<0.000000e+00> : vector<128x128xf32>
    %2 = tpu.matmul %0, %1, %cst {dimension_numbers = #tpu.dot_dimension_numbers<[1], [0], [0], [1], [0, 0, 1, 1], [], []>} : vector<128x1152xbf16>, vector<1152x128xbf16>, vector<128x128xf32> -> vector<128x128xf32>
    %c0_3 = arith.constant 0 : index
    %c0_4 = arith.constant 0 : index
    %3 = vector.load %arg3[%c0_3, %c0_4] : memref<1x128xf32, #tpu.memory_space<vmem>>, vector<1x128xf32>
    %4 = vector.broadcast %3 : vector<1x128xf32> to vector<128x128xf32>
    %5 = arith.addf %2, %4 : vector<128x128xf32>
    %cst_5 = arith.constant 0.000000e+00 : f32
    %6 = vector.broadcast %cst_5 : f32 to vector<128x128xf32>
    %7 = arith.maximumf %5, %6 : vector<128x128xf32>
    %c0_6 = arith.constant 0 : index
    %c0_7 = arith.constant 0 : index
    %8 = vector.load %arg6[%c0_6, %c0_7] : memref<128x128xf32, #tpu.memory_space<vmem>>, vector<128x128xf32>
    tpu.vector_store %arg6[%c0_6, %c0_7], %7 {strides = array<i32>} : memref<128x128xf32, #tpu.memory_space<vmem>>, vector<128x128xf32>,
    %9 = arith.truncf %7 : vector<128x128xf32> to vector<128x128xbf16>
    %c0_8 = arith.constant 0 : index
    %c0_9 = arith.constant 0 : index
    %10 = vector.load %arg4[%c0_8, %c0_9] : memref<128x1024xbf16, #tpu.memory_space<vmem>>, vector<128x1024xbf16>
    %cst_10 = arith.constant dense<0.000000e+00> : vector<128x1024xf32>
    %11 = tpu.matmul %9, %10, %cst_10 {dimension_numbers = #tpu.dot_dimension_numbers<[1], [0], [0], [1], [0, 0, 1, 1], [], []>} : vector<128x128xbf16>, vector<128x1024xbf16>, vector<128x1024xf32> -> vector<128x1024xf32>
    %c0_11 = arith.constant 0 : index
    %c0_12 = arith.constant 0 : index
    %12 = vector.load %arg5[%c0_11, %c0_12] : memref<1x1024xf32, #tpu.memory_space<vmem>>, vector<1x1024xf32>
    %13 = vector.broadcast %12 : vector<1x1024xf32> to vector<128x1024xf32>
    %14 = arith.addf %11, %13 : vector<128x1024xf32>
    %c0_13 = arith.constant 0 : index
    %c0_14 = arith.constant 0 : index
    %15 = vector.load %arg7[%c0_13, %c0_14] : memref<128x1024xf32, #tpu.memory_space<vmem>>, vector<128x1024xf32>
    tpu.vector_store %arg7[%c0_13, %c0_14], %14 {strides = array<i32>} : memref<128x1024xf32, #tpu.memory_space<vmem>>, vector<128x1024xf32>,
    return
  }
  func.func @transform_0(%arg0: i32) -> (i32, i32) {
    %c0_i32 = arith.constant 0 : i32
    %c0_i32_0 = arith.constant 0 : i32
    return %arg0, %c0_i32 : i32, i32
  }
  func.func @transform_1(%arg0: i32) -> (i32, i32) {
    %c0_i32 = arith.constant 0 : i32
    %c0_i32_0 = arith.constant 0 : i32
    %c0_i32_1 = arith.constant 0 : i32
    return %c0_i32, %c0_i32_0 : i32, i32
  }
  func.func @transform_2(%arg0: i32) -> (i32, i32) {
    %c0_i32 = arith.constant 0 : i32
    %c0_i32_0 = arith.constant 0 : i32
    %c0_i32_1 = arith.constant 0 : i32
    return %c0_i32, %c0_i32_0 : i32, i32
  }
  func.func @transform_3(%arg0: i32) -> (i32, i32) {
    %c0_i32 = arith.constant 0 : i32
    %c0_i32_0 = arith.constant 0 : i32
    %c0_i32_1 = arith.constant 0 : i32
    return %c0_i32, %c0_i32_0 : i32, i32
  }
  func.func @transform_4(%arg0: i32) -> (i32, i32) {
    %c0_i32 = arith.constant 0 : i32
    %c0_i32_0 = arith.constant 0 : i32
    %c0_i32_1 = arith.constant 0 : i32
    return %c0_i32, %c0_i32_0 : i32, i32
  }
  func.func @transform_5(%arg0: i32) -> (i32, i32) {
    %c0_i32 = arith.constant 0 : i32
    %c0_i32_0 = arith.constant 0 : i32
    return %arg0, %c0_i32 : i32, i32
  }
  func.func @transform_6(%arg0: i32) -> (i32, i32) {
    %c0_i32 = arith.constant 0 : i32
    %c0_i32_0 = arith.constant 0 : i32
    return %arg0, %c0_i32 : i32, i32
  }
}

</mosaic_0001>

<bundles_post_ra>
// kernel: tpu_custom_call.1
= control target key start
LH: loop header
LB: loop body
LE: loop exit
PB: predicated region body
PF: predicated region fallthrough
CT: control target
= control target key end

     0   :  { %12 = vsyncpa [#allocation3], 0  ;;  %s4146_s0 = inlined_call_operand.hbm [shape: bf16[128,1152], index: 0, kind: input, shape index: {}]   ;;  %s4147_s1 = inlined_call_operand.hbm [shape: bf16[1152,128], index: 1, kind: input, shape index: {}]   ;;  %s4148_s2 = inlined_call_operand.vmem [shape: f32[1,128], index: 2, kind: input, shape index: {}]   ;;  %s4149_s3 = inlined_call_operand.hbm [shape: bf16[128,1024], index: 3, kind: input, shape index: {}]   ;;  %s4150_s4 = inlined_call_operand.hbm [shape: f32[1,1024], index: 4, kind: input, shape index: {}]   ;;  %s4151_s5 = inlined_call_operand.hbm [shape: f32[128,128], index: 5, kind: output, shape index: {0}]   ;;  %s4152_s6 = inlined_call_operand.hbm [shape: f32[128,1024], index: 6, kind: output, shape index: {1}]  }
   0x1   :  { %13 = vsyncpa [#allocation6], 0 }
   0x2   :  { %14 = vsyncpa [#allocation9], 0 }
   0x3   :  { %15 = vsyncpa [#allocation4], 0 }
   0x4   :  { %16 = vsyncpa [#allocation12], 0  ;;  %s3526_s21 = smov [#allocation5]  }
   0x5   :  { %s34_s22 = sshll.u32 %s3526_s21, 4  ;;  %s35_s22 = int_to_ptr.vmem [resolvable:$true] %s34_s22 }
   0x6   :  { %s3404_s23 = scalar_lea.vmem %s35_s22, 9216  ;;  %p3409_p1 = scmp.lt.s32.totalorder %s35_s22, %s35_s22 }
   0x7   :  { %p3405_p0 = scmp.ne.s32.totalorder %s35_s22, %s3404_s23  ;;  %p3410_p2 = scmp.lt.s32.totalorder %s3404_s23, %s3404_s23 }
   0x9   :  { %p3411_p3 = por %p3410_p2, %p3409_p1 }
   0xb   :  { %p3412_p4 = pnand %p3411_p3, %p3405_p0 }
   0xd   :  { %3415 = shalt.err (!%p3412_p4)
}
   0xe   :  { %s3527_s24 = smov 64   ;;  %s3528_s25 = smov 4  }
   0xf   :  { %40 = dma.hbm_to_vmem [thread:$0]  %s4147_s1, 9216, %s35_s22, [#allocation6], %s3527_s24, %s3527_s24, %s3528_s25  }
  0x10   :  { %s3529_s28 = smov [#allocation2]  }
  0x11   :  { %s22_s29 = sshll.u32 %s3529_s28, 4  ;;  %s23_s29 = int_to_ptr.vmem [resolvable:$true] %s22_s29 }
  0x12   :  { %s3424_s30 = scalar_lea.vmem %s23_s29, 9216  ;;  %p3429_p6 = scmp.lt.s32.totalorder %s23_s29, %s23_s29 }
  0x13   :  { %p3425_p5 = scmp.ne.s32.totalorder %s23_s29, %s3424_s30  ;;  %p3430_p7 = scmp.lt.s32.totalorder %s3424_s30, %s3424_s30 }
  0x15   :  { %p3431_p8 = por %p3430_p7, %p3429_p6 }
  0x17   :  { %p3432_p9 = pnand %p3431_p8, %p3425_p5 }
  0x19   :  { %3435 = shalt.err (!%p3432_p9)
}
  0x1a   :  { %s3530_s7 = smov 576   ;;  %s3531_s8 = smov 36  }
  0x1b   :  { %28 = dma.hbm_to_vmem [thread:$0]  %s4146_s0, 9216, %s23_s29, [#allocation3], %s3530_s7, %s3530_s7, %s3531_s8  }
  0x1c   :  { %s3532_s11 = smov [#allocation7]  }
  0x1d   :  { %s48_s12 = sshll.u32 %s3532_s11, 4  ;;  %s49_s12 = int_to_ptr.vmem [resolvable:$true] %s48_s12 }
  0x1e   :  { %s3444_s1 = scalar_lea.vmem %s49_s12, 8192  ;;  %p3449_p11 = scmp.lt.s32.totalorder %s49_s12, %s49_s12 }
  0x1f   :  { %p3445_p10 = scmp.ne.s32.totalorder %s49_s12, %s3444_s1  ;;  %p3450_p12 = scmp.lt.s32.totalorder %s3444_s1, %s3444_s1 }
  0x21   :  { %p3451_p13 = por %p3450_p12, %p3449_p11 }
  0x23   :  { %p3452_p0 = pnand %p3451_p13, %p3445_p10 }
  0x25   :  { %3455 = shalt.err (!%p3452_p0)
}
  0x26   :  { %s3533_s13 = smov 512   ;;  %s3534_s14 = smov 32  }
  0x27   :  { %54 = dma.hbm_to_vmem [thread:$0]  %s4149_s3, 8192, %s49_s12, [#allocation6], %s3533_s13, %s3533_s13, %s3534_s14  }
  0x28   :  { %s3535_s17 = smov [#allocation8]  }
  0x29   :  { %s61_s18 = sshll.u32 %s3535_s17, 4  ;;  %s62_s18 = int_to_ptr.vmem [resolvable:$true] %s61_s18 }
  0x2a   :  { %s3464_s0 = scalar_lea.vmem %s62_s18, 128  ;;  %p3469_p2 = scmp.lt.s32.totalorder %s62_s18, %s62_s18 }
  0x2b   :  { %p3465_p1 = scmp.ne.s32.totalorder %s62_s18, %s3464_s0  ;;  %p3470_p3 = scmp.lt.s32.totalorder %s3464_s0, %s3464_s0 }
  0x2d   :  { %p3471_p4 = por %p3470_p3, %p3469_p2 }
  0x2f   :  { %p3472_p5 = pnand %p3471_p4, %p3465_p1 }
  0x31   :  { %3475 = shalt.err (!%p3472_p5)
}
  0x32   :  { %64 = dma.hbm_to_vmem [thread:$0]  %s4150_s4, 128, %s62_s18, [#allocation9]  }
  0x33   :  { %3516 = dma.done.wait [#allocation3], 9216  }
  0x34   :  { %3517 = vsyncadd [#allocation3], 4294958080 }
  0x35   :  { %3518 = dma.done.wait [#allocation6], 17408  }
  0x36   :  { %3519 = vsyncadd [#allocation6], 4294949888 }
  0x37   :  { %3520 = dma.done.wait [#allocation9], 128  }
  0x38   :  { %3521 = vsyncadd [#allocation9], 4294967168  ;;  %v3220_v0 = vld [vmem:[#allocation5 + $0x78] sm:$0xff]   ;;  %v3224_v4 = vld [vmem:[#allocation5 + $0x70] sm:$0xff]  }
  0x39   :  { %v3221_v1 = vld [vmem:[#allocation5 + $0x38] sm:$0xff]   ;;  %2884 = vmatprep.subr.bf16.mxu0 %v3220_v0  ;;  %v3225_v5 = vld [vmem:[#allocation5 + $0x30] sm:$0xff]   ;;  %v3228_v8 = vld [vmem:[#allocation5 + $0x68] sm:$0xff]  }
  0x3a   :  { %v3222_v2 = vld [vmem:[#allocation5 + $0xf8] sm:$0xff]   ;;  %2885 = vmatpush3.bf16.msra.mxu0 %v3221_v1  ;;  %v3226_v6 = vld [vmem:[#allocation5 + $0xf0] sm:$0xff]   ;;  %v3229_v9 = vld [vmem:[#allocation5 + $0x28] sm:$0xff]  }
  0x3b   :  { %v3223_v3 = vld [vmem:[#allocation5 + $0xb8] sm:$0xff]   ;;  %2948 = vmatprep.subr.bf16.mxu1 %v3222_v2  ;;  %2886 = vmatprep.subr.bf16.mxu0 %v3224_v4  ;;  %v3227_v7 = vld [vmem:[#allocation5 + $0xb0] sm:$0xff]   ;;  %v3230_v10 = vld [vmem:[#allocation5 + $0xe8] sm:$0xff]  }
  0x3c   :  { %2949 = vmatpush3.bf16.msra.mxu1 %v3223_v3  ;;  %v3231_v11 = vld [vmem:[#allocation5 + $0xa8] sm:$0xff]   ;;  %v3232_v12 = vld [vmem:[#allocation5 + $0x60] sm:$0xff]   ;;  %v3236_v16 = vld [vmem:[#allocation5 + $0x58] sm:$0xff]  }
  0x3d   :  { %2950 = vmatprep.subr.bf16.mxu1 %v3226_v6  ;;  %v3233_v13 = vld [vmem:[#allocation5 + $0x20] sm:$0xff]   ;;  %v3237_v17 = vld [vmem:[#allocation5 + $0x18] sm:$0xff]   ;;  %v3240_v20 = vld [vmem:[#allocation5 + $0x50] sm:$0xff]  }
  0x3e   :  { %2887 = vmatpush3.bf16.msra.mxu0 %v3225_v5  ;;  %v3234_v14 = vld [vmem:[#allocation5 + $0xe0] sm:$0xff]   ;;  %v3238_v18 = vld [vmem:[#allocation5 + $0xd8] sm:$0xff]   ;;  %v3241_v21 = vld [vmem:[#allocation5 + $0x10] sm:$0xff]  }
  0x3f   :  { %2888 = vmatprep.subr.bf16.mxu0 %v3228_v8  ;;  %v3235_v15 = vld [vmem:[#allocation5 + $0xa0] sm:$0xff]   ;;  %v3239_v19 = vld [vmem:[#allocation5 + $0x98] sm:$0xff]   ;;  %v3242_v22 = vld [vmem:[#allocation5 + $0xd0] sm:$0xff]  }
  0x40   :  { %2951 = vmatpush3.bf16.msra.mxu1 %v3227_v7  ;;  %v3243_v23 = vld [vmem:[#allocation5 + $0x90] sm:$0xff]   ;;  %v3244_v24 = vld [vmem:[#allocation5 + $0x48] sm:$0xff]   ;;  %v3248_v28 = vld [vmem:[#allocation5 + $0x40] sm:$0xff]  }
  0x41   :  { %2952 = vmatprep.subr.bf16.mxu1 %v3230_v10  ;;  %v3245_v25 = vld [vmem:[#allocation5 + $0x8] sm:$0xff]   ;;  %v3249_v29 = vld [vmem:[#allocation5] sm:$0xff]   ;;  %v3255_v34 = vld [vmem:[#allocation5 + $0x178] sm:$0xff]  }
  0x42   :  { %2889 = vmatpush3.bf16.msra.mxu0 %v3229_v9  ;;  %v3246_v26 = vld [vmem:[#allocation5 + $0xc8] sm:$0xff]   ;;  %v3250_v30 = vld [vmem:[#allocation5 + $0xc0] sm:$0xff]   ;;  %v3259_v37 = vld [vmem:[#allocation5 + $0x138] sm:$0xff]  }
  0x43   :  { %2890 = vmatprep.subr.bf16.mxu0 %v3232_v12  ;;  %v3247_v27 = vld [vmem:[#allocation5 + $0x88] sm:$0xff]   ;;  %v3251_v31 = vld [vmem:[#allocation2] ss:$36 sps:$4 sm:$0xff]   ;;  %v3263_v40 = vld [vmem:[#allocation5 + $0x170] sm:$0xff]  }
  0x44   :  { %2953 = vmatpush3.bf16.msra.mxu1 %v3231_v11  ;;  %v3253_v32 = vld [vmem:[#allocation2 + $0x4] ss:$36 sps:$4 sm:$0xff]   ;;  %v3258_v36 = vld [vmem:[#allocation2 + $0xc] ss:$36 sps:$4 sm:$0xff]   ;;  %v3264_v41 = vld [vmem:[#allocation2 + $0x54] ss:$36 sps:$4 sm:$0xff]  }
  0x45   :  { %2954 = vmatprep.subr.bf16.mxu1 %v3234_v14  ;;  %v3254_v33 = vld [vmem:[#allocation5 + $0x80] sm:$0xff]   ;;  %1141 = vmatprep.mubr.bf16.mxu0 %v3253_v32  ;;  %v3256_v35 = vld [vmem:[#allocation2 + $0x8] ss:$36 sps:$4 sm:$0xff]   ;;  %v3266_v42 = vld [vmem:[#allocation5 + $0x130] sm:$0xff]  }
  0x46   :  { %2891 = vmatpush3.bf16.msra.mxu0 %v3233_v13  ;;  %1238 = vmatprep.mubr.bf16.mxu1 %v3258_v36  ;;  %v3260_v38 = vld [vmem:[#allocation2 + $0x4c] ss:$36 sps:$4 sm:$0xff]   ;;  %v3268_v44 = vld [vmem:[#allocation2 + $0x94] ss:$36 sps:$4 sm:$0xff]   ;;  %v3272_v46 = vld [vmem:[#allocation2 + $0x9c] ss:$36 sps:$4 sm:$0xff]  }
  0x47   :  { %2892 = vmatprep.subr.bf16.mxu0 %v3236_v16  ;;  %v3262_v39 = vld [vmem:[#allocation2 + $0x48] ss:$36 sps:$4 sm:$0xff]   ;;  %v3267_v43 = vld [vmem:[#allocation2 + $0x50] ss:$36 sps:$4 sm:$0xff]   ;;  %v3276_v49 = vld [vmem:[#allocation2 + $0xdc] ss:$36 sps:$4 sm:$0xff]  }
  0x48   :  { %2955 = vmatpush3.bf16.msra.mxu1 %v3235_v15  ;;  %v3271_v45 = vld [vmem:[#allocation5 + $0x168] sm:$0xff]   ;;  %v3270_v48 = vld [vmem:[#allocation2 + $0x90] ss:$36 sps:$4 sm:$0xff]   ;;  %v3279_v50 = vld [vmem:[#allocation5 + $0x160] sm:$0xff]  }
  0x49   :  { %2956 = vmatprep.subr.bf16.mxu1 %v3238_v18  ;;  %v3274_v47 = vld [vmem:[#allocation5 + $0x128] sm:$0xff]   ;;  %v3275_v51 = vld [vmem:[#allocation2 + $0x98] ss:$36 sps:$4 sm:$0xff]   ;;  %v3282_v52 = vld [vmem:[#allocation5 + $0x120] sm:$0xff]  }
  0x4a   :  { %2893 = vmatpush3.bf16.msra.mxu0 %v3237_v17  ;;  %v3280_v53 = vld [vmem:[#allocation2 + $0xe4] ss:$36 sps:$4 sm:$0xff]   ;;  %v3287_v54 = vld [vmem:[#allocation5 + $0x158] sm:$0xff]   ;;  %v3294_v61 = vld [vmem:[#allocation5 + $0x1f0] sm:$0xff]  }
  0x4b   :  { %2894 = vmatprep.subr.bf16.mxu0 %v3240_v20  ;;  %v3278_v55 = vld [vmem:[#allocation2 + $0xd8] ss:$36 sps:$4 sm:$0xff]   ;;  %v3284_v57 = vld [vmem:[#allocation2 + $0x124] ss:$36 sps:$4 sm:$0xff]   ;;  %v3288_v62 = vld [vmem:[#allocation2 + $0x12c] ss:$36 sps:$4 sm:$0xff]  }
  0x4c   :  { %2957 = vmatpush3.bf16.msra.mxu1 %v3239_v19  ;;  %v3290_v56 = vld [vmem:[#allocation5 + $0x118] sm:$0xff]   ;;  %v3283_v58 = vld [vmem:[#allocation2 + $0xe0] ss:$36 sps:$4 sm:$0xff]   ;;  %v3297_v63 = vld [vmem:[#allocation5 + $0x1b0] sm:$0xff]  }
  0x4d   :  { %2958 = vmatprep.subr.bf16.mxu1 %v3242_v22  ;;  %v3292_v59 = vld [vmem:[#allocation5 + $0x1f8] sm:$0xff]   ;;  %v3299_v0 = vld [vmem:[#allocation5 + $0x150] sm:$0xff]   ;;  %v3286_v1 = vld [vmem:[#allocation2 + $0x120] ss:$36 sps:$4 sm:$0xff]  }
  0x4e   :  { %2895 = vmatpush3.bf16.msra.mxu0 %v3241_v21  ;;  %v3293_v60 = vld [vmem:[#allocation5 + $0x1b8] sm:$0xff]   ;;  %v3295_v2 = vld [vmem:[#allocation2 + $0x16c] ss:$36 sps:$4 sm:$0xff]   ;;  %v3306_v7 = vld [vmem:[#allocation5 + $0x1e0] sm:$0xff]  }
  0x4f   :  { %2896 = vmatprep.subr.bf16.mxu0 %v3244_v24  ;;  %v3302_v3 = vld [vmem:[#allocation5 + $0x110] sm:$0xff]   ;;  %v3291_v4 = vld [vmem:[#allocation2 + $0x128] ss:$36 sps:$4 sm:$0xff]   ;;  %v3309_v9 = vld [vmem:[#allocation5 + $0x1a0] sm:$0xff]  }
  0x50   :  { %2959 = vmatpush3.bf16.msra.mxu1 %v3243_v23  ;;  %v3304_v5 = vld [vmem:[#allocation5 + $0x1e8] sm:$0xff]   ;;  %v3300_v8 = vld [vmem:[#allocation2 + $0x174] ss:$36 sps:$4 sm:$0xff]   ;;  %v3312_v15 = vld [vmem:[#allocation2 + $0x1bc] ss:$36 sps:$4 sm:$0xff]  }
  0x51   :  { %2960 = vmatprep.subr.bf16.mxu1 %v3246_v26  ;;  %v3305_v6 = vld [vmem:[#allocation5 + $0x1a8] sm:$0xff]   ;;  %v3303_v12 = vld [vmem:[#allocation2 + $0x170] ss:$36 sps:$4 sm:$0xff]   ;;  %v3316_v16 = vld [vmem:[#allocation5 + $0x1d8] sm:$0xff]  }
  0x52   :  { %2897 = vmatpush3.bf16.msra.mxu0 %v3245_v25  ;;  %v3311_v10 = vld [vmem:[#allocation5 + $0x148] sm:$0xff]   ;;  %v3307_v13 = vld [vmem:[#allocation2 + $0x1b4] ss:$36 sps:$4 sm:$0xff]   ;;  %v3323_v21 = vld [vmem:[#allocation5 + $0x140] sm:$0xff]  }
  0x53   :  { %2898 = vmatprep.subr.bf16.mxu0 %v3248_v28  ;;  %v3298_v11 = vld [vmem:[#allocation2 + $0x168] ss:$36 sps:$4 sm:$0xff]   ;;  %v3317_v17 = vld [vmem:[#allocation5 + $0x198] sm:$0xff]   ;;  %v3318_v18 = vld [vmem:[#allocation5 + $0x1d0] sm:$0xff]  }
  0x54   :  { %2961 = vmatpush3.bf16.msra.mxu1 %v3247_v27  ;;  %v3314_v14 = vld [vmem:[#allocation5 + $0x108] sm:$0xff]   ;;  %v3310_v19 = vld [vmem:[#allocation2 + $0x1b0] ss:$36 sps:$4 sm:$0xff]   ;;  %v3319_v22 = vld [vmem:[#allocation2 + $0x1fc] ss:$36 sps:$4 sm:$0xff]  }
  0x55   :  { %2962 = vmatprep.subr.bf16.mxu1 %v3250_v30  ;;  %v3321_v20 = vld [vmem:[#allocation5 + $0x190] sm:$0xff]   ;;  %v3315_v23 = vld [vmem:[#allocation2 + $0x1b8] ss:$36 sps:$4 sm:$0xff]   ;;  %v3326_v24 = vld [vmem:[#allocation5 + $0x100] sm:$0xff]  }
  0x56   :  { %2899 = vmatpush3.bf16.msra.mxu0 %v3249_v29  ;;  %v3324_v25 = vld [vmem:[#allocation2 + $0x204] ss:$36 sps:$4 sm:$0xff]   ;;  %v3322_v29 = vld [vmem:[#allocation2 + $0x1f8] ss:$36 sps:$4 sm:$0xff]  }
  0x57   :  { %3012 = vmatprep.subr.bf16.mxu0 %v3255_v34  ;;  %v3328_v26 = vld [vmem:[#allocation5 + $0x1c8] sm:$0xff]   ;;  %v3330_v28 = vld [vmem:[#allocation5 + $0x1c0] sm:$0xff]   ;;  %v3333_v32 = vld [vmem:[#allocation2 + $0x14] ss:$36 sps:$4 sm:$0xff]  }
  0x58   :  { %2963 = vmatpush3.bf16.msra.mxu1 %v3254_v33  ;;  %v3329_v27 = vld [vmem:[#allocation5 + $0x188] sm:$0xff]   ;;  %v3334_v30 = vld [vmem:[#allocation5 + $0x180] sm:$0xff]  }
  0x59   :  { %1142 = vmatmul.mubr.bf16.vlgmr.msra.gmra.mxu0 %v3251_v31  ;;  %3076 = vmatprep.subr.bf16.mxu1 %v3292_v59  ;;  %v3335_v31 = vld [vmem:[#allocation5 + $0x238] sm:$0xff]   ;;  %v3327_v33 = vld [vmem:[#allocation2 + $0x200] ss:$36 sps:$4 sm:$0xff]  }
  0x5a   :  { %3013 = vmatpush3.bf16.msra.mxu0 %v3259_v37  ;;  %1149 = vmatprep.mubr.bf16.mxu0 %v3260_v38  ;;  %v3338_v34 = vld [vmem:[#allocation2 + $0x1c] ss:$36 sps:$4 sm:$0xff]   ;;  %v3342_v37 = vld [vmem:[#allocation5 + $0x230] sm:$0xff]  }
  0x5b   :  { %1239 = vmatmul.mubr.bf16.vlgmr.msra.gmra.mxu1 %v3256_v35  ;;  %3014 = vmatprep.subr.bf16.mxu0 %v3263_v40  ;;  %v3331_v35 = vld [vmem:[#allocation2 + $0x10] ss:$36 sps:$4 sm:$0xff]   ;;  %v3339_v36 = vld [vmem:[#allocation2 + $0x5c] ss:$36 sps:$4 sm:$0xff]   ;;  %v3349_v40 = vld [vmem:[#allocation5 + $0x228] sm:$0xff]  }
  0x5c   :  { %1246 = vmatprep.mubr.bf16.mxu1 %v3264_v41  ;;  %3077 = vmatpush3.bf16.msra.mxu1 %v3293_v60  ;;  %v3336_v38 = vld [vmem:[#allocation2 + $0x18] ss:$36 sps:$4 sm:$0xff]  }
  0x5d   :  { %3078 = vmatprep.subr.bf16.mxu1 %v3294_v61  ;;  %v3341_v41 = vld [vmem:[#allocation2 + $0x58] ss:$36 sps:$4 sm:$0xff]   ;;  %v3371_v61 = vld [vmem:[#allocation2 + $0x184] ss:$36 sps:$4 sm:$0xff]  }
  0x5e   :  { %3015 = vmatpush3.bf16.msra.mxu0 %v3266_v42  ;;  %v3346_v42 = vld [vmem:[#allocation2 + $0xa4] ss:$36 sps:$4 sm:$0xff]   ;;  %v3367_v59 = vld [vmem:[#allocation2 + $0x17c] ss:$36 sps:$4 sm:$0xff]  }
  0x5f   :  { %3016 = vmatprep.subr.bf16.mxu0 %v3271_v45  ;;  %v3350_v45 = vld [vmem:[#allocation2 + $0xac] ss:$36 sps:$4 sm:$0xff]   ;;  %v3366_v60 = vld [vmem:[#allocation2 + $0x138] ss:$36 sps:$4 sm:$0xff]  }
  0x60   :  { %3079 = vmatpush3.bf16.msra.mxu1 %v3297_v63  ;;  %v3374_v63 = vld [vmem:[#allocation2 + $0x1c4] ss:$36 sps:$4 sm:$0xff]  }
  0x61   :  { %1150 = vmatmul.mubr.bf16.gmra.mxu0 %v3262_v39  ;;  %3080 = vmatprep.subr.bf16.mxu1 %v3304_v5  ;;  %v3343_v39 = vld [vmem:[#allocation2 + $0x64] ss:$36 sps:$4 sm:$0xff]   ;;  %v3385_v5 = vld [vmem:[#allocation2 + $0x214] ss:$36 sps:$4 sm:$0xff]  }
  0x62   :  { %1157 = vmatprep.mubr.bf16.mxu0 %v3268_v44  ;;  %3017 = vmatpush3.bf16.msra.mxu0 %v3274_v47  ;;  %v3345_v44 = vld [vmem:[#allocation2 + $0x60] ss:$36 sps:$4 sm:$0xff]  }
  0x63   :  { %1247 = vmatmul.mubr.bf16.gmra.mxu1 %v3267_v43  ;;  %3018 = vmatprep.subr.bf16.mxu0 %v3279_v50  ;;  %v3356_v43 = vld [vmem:[#allocation5 + $0x220] sm:$0xff]   ;;  %v3352_v50 = vld [vmem:[#allocation2 + $0xa8] ss:$36 sps:$4 sm:$0xff]  }
  0x64   :  { %1254 = vmatprep.mubr.bf16.mxu1 %v3272_v46  ;;  %3081 = vmatpush3.bf16.msra.mxu1 %v3305_v6  ;;  %v3363_v46 = vld [vmem:[#allocation5 + $0x218] sm:$0xff]   ;;  %v3348_v47 = vld [vmem:[#allocation2 + $0xa0] ss:$36 sps:$4 sm:$0xff]   ;;  %v3383_v6 = vld [vmem:[#allocation2 + $0x208] ss:$36 sps:$4 sm:$0xff]  }
  0x65   :  { %3082 = vmatprep.subr.bf16.mxu1 %v3306_v7  ;;  %v3388_v7 = vld [vmem:[#allocation2 + $0x20] ss:$36 sps:$4 sm:$0xff]  }
  0x66   :  { %3019 = vmatpush3.bf16.msra.mxu0 %v3282_v52  ;;  %v3377_v52 = vld [vmem:[#allocation5 + $0x208] sm:$0xff]  }
  0x67   :  { %3020 = vmatprep.subr.bf16.mxu0 %v3287_v54  ;;  %v3360_v54 = vld [vmem:[#allocation2 + $0x134] ss:$36 sps:$4 sm:$0xff]  }
  0x68   :  { %3083 = vmatpush3.bf16.msra.mxu1 %v3309_v9  ;;  %v3389_v9 = vld [vmem:[#allocation2 + $0x68] ss:$36 sps:$4 sm:$0xff]  }
  0x69   :  { %1158 = vmatmul.mubr.bf16.gmra.mxu0 %v3270_v48  ;;  %3084 = vmatprep.subr.bf16.mxu1 %v3316_v16  ;;  %v3353_v48 = vld [vmem:[#allocation2 + $0xec] ss:$36 sps:$4 sm:$0xff]   ;;  %v1694_v16 = vld [vmem:[#allocation7 + $0x1e0] sm:$0xff] }
  0x6a   :  { %1165 = vmatprep.mubr.bf16.mxu0 %v3276_v49  ;;  %3021 = vmatpush3.bf16.msra.mxu0 %v3290_v56  ;;  %v3370_v49 = vld [vmem:[#allocation5 + $0x210] sm:$0xff]  }
  0x6b   :  { %1255 = vmatmul.mubr.bf16.gmra.mxu1 %v3275_v51  ;;  %3022 = vmatprep.subr.bf16.mxu0 %v3299_v0  ;;  %v3357_v51 = vld [vmem:[#allocation2 + $0xf4] ss:$36 sps:$4 sm:$0xff]   ;;  %v3373_v0 = vld [vmem:[#allocation2 + $0x180] ss:$36 sps:$4 sm:$0xff]  }
  0x6c   :  { %1262 = vmatprep.mubr.bf16.mxu1 %v3280_v53  ;;  %3085 = vmatpush3.bf16.msra.mxu1 %v3317_v17  ;;  %v3355_v53 = vld [vmem:[#allocation2 + $0xe8] ss:$36 sps:$4 sm:$0xff]   ;;  %v3359_v56 = vld [vmem:[#allocation2 + $0xf0] ss:$36 sps:$4 sm:$0xff]  }
  0x6d   :  { %3086 = vmatprep.subr.bf16.mxu1 %v3318_v18 }
  0x6e   :  { %3023 = vmatpush3.bf16.msra.mxu0 %v3302_v3  ;;  %v3381_v3 = vld [vmem:[#allocation2 + $0x20c] ss:$36 sps:$4 sm:$0xff]  }
  0x6f   :  { %3024 = vmatprep.subr.bf16.mxu0 %v3311_v10  ;;  %v3390_v10 = vld [vmem:[#allocation2 + $0xb0] ss:$36 sps:$4 sm:$0xff]  }
  0x70   :  { %3087 = vmatpush3.bf16.msra.mxu1 %v3321_v20  ;;  %v1682_v20 = vld [vmem:[#allocation7 + $0x180] sm:$0xff] }
  0x71   :  { %1166 = vmatmul.mubr.bf16.gmra.mxu0 %v3278_v55  ;;  %3088 = vmatprep.subr.bf16.mxu1 %v3328_v26  ;;  %v3384_v55 = vld [vmem:[#allocation5 + $0x200] sm:$0xff]  }
  0x72   :  { %1173 = vmatprep.mubr.bf16.mxu0 %v3284_v57  ;;  %3025 = vmatpush3.bf16.msra.mxu0 %v3314_v14  ;;  %v3364_v57 = vld [vmem:[#allocation2 + $0x13c] ss:$36 sps:$4 sm:$0xff]   ;;  %v3394_v14 = vld [vmem:[#allocation2 + $0x1d0] ss:$36 sps:$4 sm:$0xff]  }
  0x73   :  { %1263 = vmatmul.mubr.bf16.gmra.mxu1 %v3283_v58  ;;  %3026 = vmatprep.subr.bf16.mxu0 %v3323_v21  ;;  %v3362_v58 = vld [vmem:[#allocation2 + $0x130] ss:$36 sps:$4 sm:$0xff]   ;;  %v1686_v21 = vld [vmem:[#allocation7 + $0x1a0] sm:$0xff] }
  0x74   :  { %1270 = vmatprep.mubr.bf16.mxu1 %v3288_v62  ;;  %3089 = vmatpush3.bf16.msra.mxu1 %v3329_v27  ;;  %v3369_v62 = vld [vmem:[#allocation2 + $0x178] ss:$36 sps:$4 sm:$0xff]  }
  0x75   :  { %3090 = vmatprep.subr.bf16.mxu1 %v3330_v28  ;;  %v1666_v28 = vld [vmem:[#allocation7 + $0x100] sm:$0xff] }
  0x76   :  { %3027 = vmatpush3.bf16.msra.mxu0 %v3326_v24  ;;  %v1674_v24 = vld [vmem:[#allocation7 + $0x140] sm:$0xff] }
  0x77   :  { %3156 = vmatprep.subr.bf16.mxu0 %v3335_v31 }
  0x78   :  { %3091 = vmatpush3.bf16.msra.mxu1 %v3334_v30 }
  0x79   :  { %1174 = vmatmul.mubr.bf16.gmra.mxu0 %v3286_v1  ;;  %v3378_v1 = vld [vmem:[#allocation2 + $0x1cc] ss:$36 sps:$4 sm:$0xff]  }
  0x7a   :  { %1181 = vmatprep.mubr.bf16.mxu0 %v3295_v2  ;;  %v3376_v2 = vld [vmem:[#allocation2 + $0x1c0] ss:$36 sps:$4 sm:$0xff]  }
  0x7b   :  { %1271 = vmatmul.mubr.bf16.gmra.mxu1 %v3291_v4  ;;  %v3380_v4 = vld [vmem:[#allocation2 + $0x1c8] ss:$36 sps:$4 sm:$0xff]  }
  0x7c   :  { %1278 = vmatprep.mubr.bf16.mxu1 %v3300_v8  ;;  %v3387_v8 = vld [vmem:[#allocation2 + $0x210] ss:$36 sps:$4 sm:$0xff]  }
  0x81   :  { %1182 = vmatmul.mubr.bf16.gmra.mxu0 %v3298_v11  ;;  %v3391_v11 = vld [vmem:[#allocation2 + $0xf8] ss:$36 sps:$4 sm:$0xff]  }
  0x82   :  { %1189 = vmatprep.mubr.bf16.mxu0 %v3307_v13  ;;  %v3393_v13 = vld [vmem:[#allocation2 + $0x188] ss:$36 sps:$4 sm:$0xff]  }
  0x83   :  { %1279 = vmatmul.mubr.bf16.gmra.mxu1 %v3303_v12  ;;  %v3392_v12 = vld [vmem:[#allocation2 + $0x140] ss:$36 sps:$4 sm:$0xff]  }
  0x84   :  { %1286 = vmatprep.mubr.bf16.mxu1 %v3312_v15  ;;  %v1690_v15 = vld [vmem:[#allocation7 + $0x1c0] sm:$0xff] }
  0x85   :  { %v2876_v17 = vcombine.low %v1690_v15, %v1694_v16  ;;  %v2877_v18 = vcombine.high %v1690_v15, %v1694_v16 }
  0x87   :  { %2060 = vmatprep.subr.bf16.mxu1 %v2877_v18 }
  0x89   :  { %1190 = vmatmul.mubr.bf16.gmra.mxu0 %v3310_v19  ;;  %v3395_v19 = vld [vmem:[#allocation2 + $0x218] ss:$36 sps:$4 sm:$0xff]  }
  0x8a   :  { %1197 = vmatprep.mubr.bf16.mxu0 %v3319_v22  ;;  %v2868_v22 = vcombine.low %v1682_v20, %v1686_v21 }
  0x8b   :  { %1287 = vmatmul.mubr.bf16.gmra.mxu1 %v3315_v23  ;;  %v2869_v23 = vcombine.high %v1682_v20, %v1686_v21  ;;  %v1634_v20 = vld [vmem:[#allocation7] sm:$0xff] }
  0x8c   :  { %1294 = vmatprep.mubr.bf16.mxu1 %v3324_v25  ;;  %v1678_v25 = vld [vmem:[#allocation7 + $0x160] sm:$0xff] }
  0x8d   :  { %v2860_v26 = vcombine.low %v1674_v24, %v1678_v25  ;;  %v2861_v27 = vcombine.high %v1674_v24, %v1678_v25  ;;  %v1638_v21 = vld [vmem:[#allocation7 + $0x20] sm:$0xff] }
  0x8e   :  { %v2821_v25 = vcombine.high %v1634_v20, %v1638_v21 }
  0x91   :  { %1198 = vmatmul.mubr.bf16.gmra.mxu0 %v3322_v29  ;;  %v1670_v29 = vld [vmem:[#allocation7 + $0x120] sm:$0xff] }
  0x92   :  { %1335 = vmatprep.mubr.bf16.mxu0 %v3333_v32  ;;  %v2852_v30 = vcombine.low %v1666_v28, %v1670_v29  ;;  %v1691_v32 = vld [vmem:[#allocation7 + $0x1c8] sm:$0xff] }
  0x93   :  { %1295 = vmatmul.mubr.bf16.gmra.mxu1 %v3327_v33  ;;  %v1695_v33 = vld [vmem:[#allocation7 + $0x1e8] sm:$0xff] }
  0x94   :  { %1432 = vmatprep.mubr.bf16.mxu1 %v3338_v34  ;;  %v2879_v34 = vcombine.high %v1691_v32, %v1695_v33 }
  0x99   :  { %1336 = vmatmul.mubr.bf16.vlgmr.msra.gmra.mxu0 %v3331_v35  ;;  %v2878_v35 = vcombine.low %v1691_v32, %v1695_v33 }
  0x9a   :  { %3157 = vmatpush3.bf16.msra.mxu0 %v3335_v31  ;;  %1343 = vmatprep.mubr.bf16.mxu0 %v3339_v36  ;;  %v2853_v31 = vcombine.high %v1666_v28, %v1670_v29  ;;  %v1658_v36 = vld [vmem:[#allocation7 + $0xc0] sm:$0xff]  ;;  %v2820_v29 = vcombine.low %v1634_v20, %v1638_v21 }
  0x9b   :  { %3158 = vmatprep.subr.bf16.mxu0 %v3342_v37  ;;  %1433 = vmatmul.mubr.bf16.vlgmr.msra.gmra.mxu1 %v3336_v38 }
  0x9c   :  { %1440 = vmatprep.mubr.bf16.mxu1 %v3343_v39  ;;  %2061 = vmatpush1.bf16.msra.mxu1 %v2876_v17 }
  0x9d   :  { %2062 = vmatprep.subr.bf16.mxu1 %v2869_v23 }
  0x9e   :  { %3159 = vmatpush3.bf16.msra.mxu0 %v3342_v37  ;;  %v1662_v37 = vld [vmem:[#allocation7 + $0xe0] sm:$0xff] }
  0x9f   :  { %3160 = vmatprep.subr.bf16.mxu0 %v3349_v40  ;;  %v2844_v38 = vcombine.low %v1658_v36, %v1662_v37  ;;  %v2845_v39 = vcombine.high %v1658_v36, %v1662_v37 }
  0xa0   :  { %2063 = vmatpush1.bf16.msra.mxu1 %v2868_v22  ;;  %v1635_v22 = vld [vmem:[#allocation7 + $0x8] sm:$0xff] }
  0xa1   :  { %1344 = vmatmul.mubr.bf16.gmra.mxu0 %v3341_v41  ;;  %2064 = vmatprep.subr.bf16.mxu1 %v2861_v27  ;;  %v1687_v41 = vld [vmem:[#allocation7 + $0x1a8] sm:$0xff] }
  0xa2   :  { %1351 = vmatprep.mubr.bf16.mxu0 %v3346_v42  ;;  %3161 = vmatpush3.bf16.msra.mxu0 %v3349_v40  ;;  %v1683_v40 = vld [vmem:[#allocation7 + $0x188] sm:$0xff] }
  0xa3   :  { %3162 = vmatprep.subr.bf16.mxu0 %v3356_v43  ;;  %1441 = vmatmul.mubr.bf16.gmra.mxu1 %v3345_v44  ;;  %v2871_v42 = vcombine.high %v1683_v40, %v1687_v41  ;;  %v1675_v44 = vld [vmem:[#allocation7 + $0x148] sm:$0xff] }
  0xa4   :  { %1448 = vmatprep.mubr.bf16.mxu1 %v3350_v45  ;;  %2065 = vmatpush1.bf16.msra.mxu1 %v2860_v26  ;;  %v1679_v45 = vld [vmem:[#allocation7 + $0x168] sm:$0xff] }
  0xa5   :  { %2066 = vmatprep.subr.bf16.mxu1 %v2853_v31  ;;  %v1639_v26 = vld [vmem:[#allocation7 + $0x28] sm:$0xff] }
  0xa6   :  { %3163 = vmatpush3.bf16.msra.mxu0 %v3356_v43  ;;  %v2870_v43 = vcombine.low %v1683_v40, %v1687_v41  ;;  %v2823_v31 = vcombine.high %v1635_v22, %v1639_v26  ;;  %v4153_v40 = vmov 0  }
  0xa7   :  { %3164 = vmatprep.subr.bf16.mxu0 %v3363_v46 }
  0xa8   :  { %2067 = vmatpush1.bf16.msra.mxu1 %v2852_v30  ;;  %v2822_v30 = vcombine.low %v1635_v22, %v1639_v26 }
  0xa9   :  { %1352 = vmatmul.mubr.bf16.gmra.mxu0 %v3348_v47  ;;  %2068 = vmatprep.subr.bf16.mxu1 %v2845_v39  ;;  %v2862_v47 = vcombine.low %v1675_v44, %v1679_v45 }
  0xaa   :  { %1359 = vmatprep.mubr.bf16.mxu0 %v3353_v48  ;;  %3165 = vmatpush3.bf16.msra.mxu0 %v3363_v46  ;;  %v2863_v46 = vcombine.high %v1675_v44, %v1679_v45  ;;  %v1650_v48 = vld [vmem:[#allocation7 + $0x80] sm:$0xff] }
  0xab   :  { %3166 = vmatprep.subr.bf16.mxu0 %v3370_v49  ;;  %1449 = vmatmul.mubr.bf16.gmra.mxu1 %v3352_v50 }
  0xac   :  { %1456 = vmatprep.mubr.bf16.mxu1 %v3357_v51  ;;  %2069 = vmatpush1.bf16.msra.mxu1 %v2844_v38 }
  0xae   :  { %3167 = vmatpush3.bf16.msra.mxu0 %v3370_v49  ;;  %v1654_v49 = vld [vmem:[#allocation7 + $0xa0] sm:$0xff] }
  0xaf   :  { %3168 = vmatprep.subr.bf16.mxu0 %v3377_v52  ;;  %v2836_v50 = vcombine.low %v1650_v48, %v1654_v49  ;;  %v2837_v51 = vcombine.high %v1650_v48, %v1654_v49  ;;  %v3608_v49 = vld [vmem:[#allocation7 + $0x1d0] sm:$0xff] }
  0xb0   :  { %4159 = vst [vmem:[#allocation18_spill] sm:$0xff] %v3608_v49 }
  0xb1   :  { %1360 = vmatmul.mubr.bf16.gmra.mxu0 %v3355_v53  ;;  %v1671_v53 = vld [vmem:[#allocation7 + $0x128] sm:$0xff]  ;;  %2070 = vmatprep.subr.bf16.mxu1 %v2837_v51 }
  0xb2   :  { %1367 = vmatprep.mubr.bf16.mxu0 %v3360_v54  ;;  %3169 = vmatpush3.bf16.msra.mxu0 %v3377_v52  ;;  %v1667_v52 = vld [vmem:[#allocation7 + $0x108] sm:$0xff] }
  0xb3   :  { %3170 = vmatprep.subr.bf16.mxu0 %v3384_v55  ;;  %1457 = vmatmul.mubr.bf16.gmra.mxu1 %v3359_v56  ;;  %v2855_v54 = vcombine.high %v1667_v52, %v1671_v53  ;;  %v1659_v56 = vld [vmem:[#allocation7 + $0xc8] sm:$0xff] }
  0xb4   :  { %1464 = vmatprep.mubr.bf16.mxu1 %v3364_v57  ;;  %2071 = vmatpush1.bf16.msra.mxu1 %v2836_v50  ;;  %v1663_v57 = vld [vmem:[#allocation7 + $0xe8] sm:$0xff]  ;;  %v3610_v50 = vld [vmem:[#allocation7 + $0x1f0] sm:$0xff] }
  0xb5   :  { %4160 = vst [vmem:[#allocation19_spill] sm:$0xff] %v3610_v50 }
  0xb6   :  { %3171 = vmatpush3.bf16.msra.mxu0 %v3384_v55  ;;  %v2854_v55 = vcombine.low %v1667_v52, %v1671_v53 }
  0xb7   :  { %2173 = vmatprep.subr.bf16.mxu0 %v2879_v34 }
  0xb9   :  { %1368 = vmatmul.mubr.bf16.gmra.mxu0 %v3362_v58  ;;  %v2847_v58 = vcombine.high %v1659_v56, %v1663_v57 }
  0xba   :  { %1375 = vmatprep.mubr.bf16.mxu0 %v3367_v59  ;;  %v2846_v59 = vcombine.low %v1659_v56, %v1663_v57 }
  0xbb   :  { %1465 = vmatmul.mubr.bf16.gmra.mxu1 %v3366_v60  ;;  %v1642_v60 = vld [vmem:[#allocation7 + $0x40] sm:$0xff] }
  0xbc   :  { %1472 = vmatprep.mubr.bf16.mxu1 %v3371_v61  ;;  %v1646_v61 = vld [vmem:[#allocation7 + $0x60] sm:$0xff] }
  0xc1   :  { %1376 = vmatmul.mubr.bf16.gmra.mxu0 %v3369_v62  ;;  %v2828_v62 = vcombine.low %v1642_v60, %v1646_v61 }
  0xc2   :  { %1383 = vmatprep.mubr.bf16.mxu0 %v3374_v63  ;;  %v2829_v63 = vcombine.high %v1642_v60, %v1646_v61 }
  0xc3   :  { %1473 = vmatmul.mubr.bf16.gmra.mxu1 %v3373_v0  ;;  %v1651_v0 = vld [vmem:[#allocation7 + $0x88] sm:$0xff] }
  0xc4   :  { %1480 = vmatprep.mubr.bf16.mxu1 %v3378_v1  ;;  %v1655_v1 = vld [vmem:[#allocation7 + $0xa8] sm:$0xff]  ;;  %2072 = vmatprep.subr.bf16.mxu1 %v2829_v63 }
  0xc5   :  { %2073 = vmatpush1.bf16.msra.mxu1 %v2828_v62 }
  0xc6   :  { %2074 = vmatprep.subr.bf16.mxu1 %v2821_v25 }
  0xc9   :  { %1384 = vmatmul.mubr.bf16.gmra.mxu0 %v3376_v2  ;;  %2075 = vmatpush1.bf16.msra.mxu1 %v2820_v29 }
  0xca   :  { %1391 = vmatprep.mubr.bf16.mxu0 %v3381_v3  ;;  %v2839_v3 = vcombine.high %v1651_v0, %v1655_v1 }
  0xcb   :  { %1481 = vmatmul.mubr.bf16.gmra.mxu1 %v3380_v4  ;;  %v2838_v4 = vcombine.low %v1651_v0, %v1655_v1 }
  0xcc   :  { %1488 = vmatprep.mubr.bf16.mxu1 %v3385_v5  ;;  %v3594_v5 = vld [vmem:[%s4148_s2] ss:$0 sm:$0xff]  ;;  %s3537_s2 = smov [#allocation10]  }
  0xcd   :  { %s2645_s21 = sshll.u32 %s3537_s2, 4  ;;  %s2646_s21 = int_to_ptr.vmem [resolvable:$true] %s2645_s21 }
  0xce   :  { %s3476_s22 = scalar_lea.vmem %s2646_s21, 2048  ;;  %p3481_p7 = scmp.lt.s32.totalorder %s2646_s21, %s2646_s21 }
  0xcf   :  { %p3477_p6 = scmp.ne.s32.totalorder %s2646_s21, %s3476_s22  ;;  %p3482_p8 = scmp.lt.s32.totalorder %s3476_s22, %s3476_s22 }
  0xd1   :  { %1392 = vmatmul.mubr.bf16.gmra.mxu0 %v3383_v6  ;;  %p3483_p9 = por %p3482_p8, %p3481_p7 }
  0xd2   :  { %3172 = vmatprep.mubr.bf16.mxu0 %v3388_v7 }
  0xd3   :  { %1489 = vmatmul.mubr.bf16.gmra.mxu1 %v3387_v8  ;;  %p3484_p10 = pnand %p3483_p9, %p3477_p6 }
  0xd4   :  { %2092 = vmatprep.mubr.bf16.mxu1 %v4153_v40 }
  0xd9   :  { %3173 = vmatmul.mubr.bf16.vlgmr.msra.gmra.mxu0 %v3389_v9  ;;  %v1643_v9 = vld [vmem:[#allocation7 + $0x48] sm:$0xff] }
  0xda   :  { %3176 = vmatprep.mubr.bf16.mxu0 %v3390_v10  ;;  %2174 = vmatpush1.bf16.msra.mxu0 %v2878_v35  ;;  %v1647_v10 = vld [vmem:[#allocation7 + $0x68] sm:$0xff] }
  0xdb   :  { %2175 = vmatprep.subr.bf16.mxu0 %v2871_v42  ;;  %v2830_v15 = vcombine.low %v1643_v9, %v1647_v10 }
  0xde   :  { %2176 = vmatpush1.bf16.msra.mxu0 %v2870_v43 }
  0xdf   :  { %2177 = vmatprep.subr.bf16.mxu0 %v2863_v46 }
  0xe1   :  { %3177 = vmatmul.mubr.bf16.gmra.mxu0 %v3391_v11 }
  0xe2   :  { %3180 = vmatprep.mubr.bf16.mxu0 %v3392_v12  ;;  %2178 = vmatpush1.bf16.msra.mxu0 %v2862_v47  ;;  %v2831_v12 = vcombine.high %v1643_v9, %v1647_v10 }
  0xe3   :  { %2179 = vmatprep.subr.bf16.mxu0 %v2855_v54  ;;  %v2881_v54 = vcombine.high %v3608_v49, %v3610_v50 }
  0xe5   :  { %2286 = vmatprep.subr.bf16.mxu1 %v2881_v54 }
  0xe6   :  { %2180 = vmatpush1.bf16.msra.mxu0 %v2854_v55 }
  0xe7   :  { %2181 = vmatprep.subr.bf16.mxu0 %v2847_v58 }
  0xe9   :  { %3181 = vmatmul.mubr.bf16.gmra.mxu0 %v3393_v13 }
  0xea   :  { %3184 = vmatprep.mubr.bf16.mxu0 %v3394_v14  ;;  %2182 = vmatpush1.bf16.msra.mxu0 %v2846_v59 }
  0xeb   :  { %2183 = vmatprep.subr.bf16.mxu0 %v2839_v3 }
  0xee   :  { %2184 = vmatpush1.bf16.msra.mxu0 %v2838_v4 }
  0xef   :  { %2185 = vmatprep.subr.bf16.mxu0 %v2831_v12 }
  0xf1   :  { %3185 = vmatmul.mubr.bf16.gmra.mxu0 %v3395_v19 }
  0xf2   :  { %2186 = vmatpush1.bf16.msra.mxu0 %v2830_v15  ;;  %2205 = vmatprep.mubr.bf16.mxu0 %v4153_v40 }
  0xf3   :  { %2187 = vmatprep.subr.bf16.mxu0 %v2823_v31 }
  0xf6   :  { %2188 = vmatpush1.bf16.msra.mxu0 %v2822_v30 }
 0x119   :  { %v2900_v2 = vpop.f32.mrf.mxu0 }
 0x11b   :  { %v2901_v6 = vpop.f32.mrf.mxu0  ;;  %v2964_v8 = vpop.f32.mrf.mxu1 }
 0x11c   :  { %v2902_v7 = vadd.f32 %v2901_v6, %v2900_v2 }
 0x11d   :  { %v2903_v11 = vpop.f32.mrf.mxu0  ;;  %v2965_v14 = vpop.f32.mrf.mxu1 }
 0x11e   :  { %v1144_v13 = vadd.f32 %v2902_v7, %v3594_v5  ;;  %v2966_v16 = vadd.f32 %v2965_v14, %v2964_v8 }
 0x11f   :  { %v2904_v17 = vpop.f32.mrf.mxu0  ;;  %v2967_v19 = vpop.f32.mrf.mxu1 }
 0x120   :  { %v2905_v18 = vadd.f32 %v2904_v17, %v2903_v11  ;;  %v3597_v23 = vadd.f32 %v2966_v16, %v1144_v13 }
 0x121   :  { %v2906_v24 = vpop.f32.mrf.mxu0  ;;  %v2968_v28 = vpop.f32.mrf.mxu1 }
 0x122   :  { %v1147_v27 = vadd.f32 %v2905_v18, %v3594_v5  ;;  %v2969_v32 = vadd.f32 %v2968_v28, %v2967_v19 }
 0x123   :  { %v2907_v33 = vpop.f32.mrf.mxu0  ;;  %v2970_v35 = vpop.f32.mrf.mxu1 }
 0x124   :  { %v2908_v34 = vadd.f32 %v2907_v33, %v2906_v24  ;;  %v3600_v36 = vadd.f32 %v2969_v32, %v1147_v27 }
 0x125   :  { %v2909_v37 = vpop.f32.mrf.mxu0  ;;  %v2971_v39 = vpop.f32.mrf.mxu1 }
 0x126   :  { %v1152_v38 = vadd.f32 %v2908_v34, %v3594_v5  ;;  %v2972_v41 = vadd.f32 %v2971_v39, %v2970_v35 }
 0x127   :  { %v2910_v42 = vpop.f32.mrf.mxu0  ;;  %v2973_v44 = vpop.f32.mrf.mxu1 }
 0x128   :  { %v2911_v43 = vadd.f32 %v2910_v42, %v2909_v37  ;;  %v3605_v45 = vadd.f32 %v2972_v41, %v1152_v38 }
 0x129   :  { %v2912_v46 = vpop.f32.mrf.mxu0  ;;  %v2974_v48 = vpop.f32.mrf.mxu1 }
 0x12a   :  { %v1155_v47 = vadd.f32 %v2911_v43, %v3594_v5  ;;  %v2975_v51 = vadd.f32 %v2974_v48, %v2973_v44 }
 0x12b   :  { %v2913_v52 = vpop.f32.mrf.mxu0  ;;  %v2976_v56 = vpop.f32.mrf.mxu1 }
 0x12c   :  { %v2914_v55 = vadd.f32 %v2913_v52, %v2912_v46  ;;  %v3616_v57 = vadd.f32 %v2975_v51, %v1155_v47  ;;  %v1693_v46 = vld [vmem:[#allocation7 + $0x1d8] sm:$0xff] }
 0x12d   :  { %v2915_v58 = vpop.f32.mrf.mxu0  ;;  %v2977_v60 = vpop.f32.mrf.mxu1  ;;  %v1697_v47 = vld [vmem:[#allocation7 + $0x1f8] sm:$0xff] }
 0x12e   :  { %v1160_v59 = vadd.f32 %v2914_v55, %v3594_v5  ;;  %v2978_v61 = vadd.f32 %v2977_v60, %v2976_v56  ;;  %v3636_v52 = vcombine.high %v1693_v46, %v1697_v47  ;;  %v3639_v56 = vcombine.low %v1693_v46, %v1697_v47 }
 0x12f   :  { %v2916_v62 = vpop.f32.mrf.mxu0  ;;  %v2979_v0 = vpop.f32.mrf.mxu1 }
 0x130   :  { %v2917_v63 = vadd.f32 %v2916_v62, %v2915_v58  ;;  %v3619_v1 = vadd.f32 %v2978_v61, %v1160_v59  ;;  %4163 = vst [vmem:[#allocation22_spill] sm:$0xff] %v3636_v52  ;;  %4164 = vst [vmem:[#allocation23_spill] sm:$0xff] %v3639_v56  ;;  %2399 = vmatprep.subr.bf16.mxu0 %v3636_v52 }
 0x131   :  { %v2918_v2 = vpop.f32.mrf.mxu0  ;;  %v2980_v4 = vpop.f32.mrf.mxu1 }
 0x132   :  { %v1163_v3 = vadd.f32 %v2917_v63, %v3594_v5  ;;  %v2981_v6 = vadd.f32 %v2980_v4, %v2979_v0 }
 0x133   :  { %v2919_v7 = vpop.f32.mrf.mxu0  ;;  %v2982_v9 = vpop.f32.mrf.mxu1 }
 0x134   :  { %v2920_v8 = vadd.f32 %v2919_v7, %v2918_v2  ;;  %v3622_v10 = vadd.f32 %v2981_v6, %v1163_v3 }
 0x135   :  { %v2921_v11 = vpop.f32.mrf.mxu0  ;;  %v2983_v13 = vpop.f32.mrf.mxu1 }
 0x136   :  { %v1168_v12 = vadd.f32 %v2920_v8, %v3594_v5  ;;  %v2984_v14 = vadd.f32 %v2983_v13, %v2982_v9 }
 0x137   :  { %v2922_v15 = vpop.f32.mrf.mxu0  ;;  %v2985_v17 = vpop.f32.mrf.mxu1 }
 0x138   :  { %v2923_v16 = vadd.f32 %v2922_v15, %v2921_v11  ;;  %v3625_v18 = vadd.f32 %v2984_v14, %v1168_v12 }
 0x139   :  { %v2924_v19 = vpop.f32.mrf.mxu0  ;;  %v2986_v21 = vpop.f32.mrf.mxu1 }
 0x13a   :  { %v1171_v20 = vadd.f32 %v2923_v16, %v3594_v5  ;;  %v2987_v22 = vadd.f32 %v2986_v21, %v2985_v17 }
 0x13b   :  { %v2925_v24 = vpop.f32.mrf.mxu0  ;;  %v2988_v26 = vpop.f32.mrf.mxu1 }
 0x13c   :  { %v2926_v25 = vadd.f32 %v2925_v24, %v2924_v19  ;;  %v3628_v27 = vadd.f32 %v2987_v22, %v1171_v20 }
 0x13d   :  { %v2927_v28 = vpop.f32.mrf.mxu0  ;;  %v2989_v30 = vpop.f32.mrf.mxu1 }
 0x13e   :  { %v1176_v29 = vadd.f32 %v2926_v25, %v3594_v5  ;;  %v2990_v31 = vadd.f32 %v2989_v30, %v2988_v26 }
 0x13f   :  { %v2928_v32 = vpop.f32.mrf.mxu0  ;;  %v2991_v34 = vpop.f32.mrf.mxu1 }
 0x140   :  { %v2929_v33 = vadd.f32 %v2928_v32, %v2927_v28  ;;  %v3631_v35 = vadd.f32 %v2990_v31, %v1176_v29 }
 0x141   :  { %v2930_v37 = vpop.f32.mrf.mxu0  ;;  %v2992_v39 = vpop.f32.mrf.mxu1 }
 0x142   :  { %4161 = vst [vmem:[#allocation20_spill] sm:$0xff] %v3631_v35  ;;  %v1179_v38 = vadd.f32 %v2929_v33, %v3594_v5  ;;  %v2993_v41 = vadd.f32 %v2992_v39, %v2991_v34 }
 0x143   :  { %v2931_v42 = vpop.f32.mrf.mxu0  ;;  %v2994_v44 = vpop.f32.mrf.mxu1 }
 0x144   :  { %v2932_v43 = vadd.f32 %v2931_v42, %v2930_v37  ;;  %v3634_v48 = vadd.f32 %v2993_v41, %v1179_v38 }
 0x145   :  { %v2933_v51 = vpop.f32.mrf.mxu0  ;;  %v2995_v55 = vpop.f32.mrf.mxu1 }
 0x146   :  { %4162 = vst [vmem:[#allocation21_spill] sm:$0xff] %v3634_v48  ;;  %v1184_v54 = vadd.f32 %v2932_v43, %v3594_v5  ;;  %v2996_v58 = vadd.f32 %v2995_v55, %v2994_v44 }
 0x147   :  { %v2934_v59 = vpop.f32.mrf.mxu0  ;;  %v2997_v61 = vpop.f32.mrf.mxu1 }
 0x148   :  { %v2935_v60 = vadd.f32 %v2934_v59, %v2933_v51  ;;  %v3642_v62 = vadd.f32 %v2996_v58, %v1184_v54 }
 0x149   :  { %v2936_v63 = vpop.f32.mrf.mxu0  ;;  %v2998_v2 = vpop.f32.mrf.mxu1 }
 0x14a   :  { %v1187_v0 = vadd.f32 %v2935_v60, %v3594_v5  ;;  %v2999_v3 = vadd.f32 %v2998_v2, %v2997_v61 }
 0x14b   :  { %v2937_v4 = vpop.f32.mrf.mxu0  ;;  %v3000_v7 = vpop.f32.mrf.mxu1 }
 0x14c   :  { %v2938_v6 = vadd.f32 %v2937_v4, %v2936_v63  ;;  %v3645_v8 = vadd.f32 %v2999_v3, %v1187_v0 }
 0x14d   :  { %v2939_v9 = vpop.f32.mrf.mxu0  ;;  %v3001_v12 = vpop.f32.mrf.mxu1 }
 0x14e   :  { %4165 = vst [vmem:[#allocation24_spill] sm:$0xff] %v3645_v8  ;;  %v1192_v11 = vadd.f32 %v2938_v6, %v3594_v5  ;;  %v3002_v13 = vadd.f32 %v3001_v12, %v3000_v7 }
 0x14f   :  { %v2940_v14 = vpop.f32.mrf.mxu0  ;;  %v3003_v16 = vpop.f32.mrf.mxu1 }
 0x150   :  { %v2941_v15 = vadd.f32 %v2940_v14, %v2939_v9  ;;  %v3648_v17 = vadd.f32 %v3002_v13, %v1192_v11 }
 0x151   :  { %v2942_v19 = vpop.f32.mrf.mxu0  ;;  %v3004_v21 = vpop.f32.mrf.mxu1 }
 0x152   :  { %4166 = vst [vmem:[#allocation25_spill] sm:$0xff] %v3648_v17  ;;  %v1195_v20 = vadd.f32 %v2941_v15, %v3594_v5  ;;  %v3005_v22 = vadd.f32 %v3004_v21, %v3003_v16 }
 0x153   :  { %v2943_v24 = vpop.f32.mrf.mxu0  ;;  %v3653_v26 = vpop.f32.mrf.mxu1 }
 0x154   :  { %v3651_v25 = vadd.f32 %v2943_v24, %v2942_v19  ;;  %v3655_v28 = vadd.f32 %v3005_v22, %v1195_v20 }
 0x155   :  { %v2945_v29 = vpop.f32.mrf.mxu0  ;;  %v3657_v30 = vpop.f32.mrf.mxu1 }
 0x156   :  { %4167 = vst [vmem:[#allocation26_spill] sm:$0xff] %v3655_v28 }
 0x157   :  { %v2946_v31 = vpop.f32.mrf.mxu0  ;;  %v3661_v33 = vpop.f32.mrf.mxu1 }
 0x158   :  { %v3659_v32 = vadd.f32 %v2946_v31, %v2945_v29  ;;  %4169 = vst [vmem:[#allocation28_spill] sm:$0xff] %v3661_v33 }
 0x159   :  { %v3028_v34 = vpop.f32.mrf.mxu0  ;;  %v3663_v37 = vpop.f32.mrf.mxu1 }
 0x15a   :  { %4168 = vst [vmem:[#allocation27_spill] sm:$0xff] %v3659_v32  ;;  %4170 = vst [vmem:[#allocation29_spill] sm:$0xff] %v3663_v37 }
 0x15b   :  { %v3029_v38 = vpop.f32.mrf.mxu0  ;;  %v3092_v39 = vpop.f32.mrf.mxu1 }
 0x15d   :  { %v3031_v41 = vpop.f32.mrf.mxu0  ;;  %v3093_v42 = vpop.f32.mrf.mxu1 }
 0x15f   :  { %v3032_v43 = vpop.f32.mrf.mxu0  ;;  %v3665_v44 = vpop.f32.mrf.mxu1 }
 0x161   :  { %v3034_v46 = vpop.f32.mrf.mxu0  ;;  %v3667_v47 = vpop.f32.mrf.mxu1 }
 0x163   :  { %v3035_v51 = vpop.f32.mrf.mxu0  ;;  %v3098_v54 = vpop.f32.mrf.mxu1 }
 0x165   :  { %v3037_v55 = vpop.f32.mrf.mxu0  ;;  %v3099_v58 = vpop.f32.mrf.mxu1 }
 0x167   :  { %v3038_v59 = vpop.f32.mrf.mxu0  ;;  %v3101_v60 = vpop.f32.mrf.mxu1 }
 0x168   :  { %v3039_v35 = vadd.f32 %v3038_v59, %v3037_v55 }
 0x169   :  { %v3040_v61 = vpop.f32.mrf.mxu0  ;;  %v3102_v63 = vpop.f32.mrf.mxu1 }
 0x16b   :  { %v3041_v0 = vpop.f32.mrf.mxu0  ;;  %v3669_v2 = vpop.f32.mrf.mxu1 }
 0x16d   :  { %v3671_v3 = vpop.f32.mrf.mxu0  ;;  %v3673_v4 = vpop.f32.mrf.mxu1 }
 0x16f   :  { %v3675_v6 = vpop.f32.mrf.mxu0  ;;  %v3677_v7 = vpop.f32.mrf.mxu1 }
 0x171   :  { %v3046_v9 = vpop.f32.mrf.mxu0  ;;  %v3679_v11 = vpop.f32.mrf.mxu1 }
 0x173   :  { %v3047_v12 = vpop.f32.mrf.mxu0  ;;  %v3681_v13 = vpop.f32.mrf.mxu1 }
 0x174   :  { %v3048_v59 = vadd.f32 %v3047_v12, %v3046_v9  ;;  %v3106_v12 = vadd.f32 %v3673_v4, %v3669_v2 }
 0x175   :  { %v3049_v14 = vpop.f32.mrf.mxu0  ;;  %v3111_v15 = vpop.f32.mrf.mxu1 }
 0x177   :  { %v3050_v16 = vpop.f32.mrf.mxu0  ;;  %v3683_v19 = vpop.f32.mrf.mxu1 }
 0x179   :  { %v3685_v20 = vpop.f32.mrf.mxu0  ;;  %v3687_v21 = vpop.f32.mrf.mxu1 }
 0x17a   :  { %v3115_v2 = vadd.f32 %v3687_v21, %v3683_v19 }
 0x17b   :  { %v3689_v22 = vpop.f32.mrf.mxu0  ;;  %v3691_v24 = vpop.f32.mrf.mxu1 }
 0x17c   :  { %4171 = vst [vmem:[#allocation30_spill] sm:$0xff] %v3691_v24  ;;  %v3030_v24 = vadd.f32 %v3029_v38, %v3028_v34  ;;  %v1349_v34 = vadd.f32 %v3039_v35, %v3616_v57  ;;  %v3103_v38 = vadd.f32 %v3102_v63, %v3101_v60  ;;  %v3097_v57 = vadd.f32 %v3667_v47, %v3665_v44  ;;  %v3761_v63 = vld [vmem:[#allocation7 + $0x110] sm:$0xff] }
 0x17d   :  { %v3693_v29 = vpop.f32.mrf.mxu0  ;;  %v3695_v31 = vpop.f32.mrf.mxu1  ;;  %v3054_v19 = vadd.f32 %v3689_v22, %v3685_v20 }
 0x17e   :  { %4172 = vst [vmem:[#allocation31_spill] sm:$0xff] %v3693_v29  ;;  %4173 = vst [vmem:[#allocation32_spill] sm:$0xff] %v3695_v31 }
 0x17f   :  { %v3697_v40 = vpop.f32.mrf.mxu0  ;;  %v3699_v53 = vpop.f32.mrf.mxu1 }
 0x180   :  { %4174 = vst [vmem:[#allocation33_spill] sm:$0xff] %v3697_v40  ;;  %4175 = vst [vmem:[#allocation34_spill] sm:$0xff] %v3699_v53  ;;  %v3036_v40 = vadd.f32 %v3035_v51, %v3034_v46  ;;  %v3739_v46 = vld [vmem:[#allocation7 + $0x190] sm:$0xff] }
 0x181   :  { %v3701_v52 = vpop.f32.mrf.mxu0  ;;  %v3703_v28 = vpop.f32.mrf.mxu1  ;;  %v3741_v51 = vld [vmem:[#allocation7 + $0x1b0] sm:$0xff] }
 0x182   :  { %4176 = vst [vmem:[#allocation35_spill] sm:$0xff] %v3703_v28  ;;  %v2873_v60 = vcombine.high %v3739_v46, %v3741_v51 }
 0x183   :  { %v3705_v17 = vpop.f32.mrf.mxu0  ;;  %v3707_v56 = vpop.f32.mrf.mxu1 }
 0x184   :  { %4177 = vst [vmem:[#allocation36_spill] sm:$0xff] %v3707_v56 }
 0x185   :  { %v3709_v48 = vpop.f32.mrf.mxu0  ;;  %v3711_v37 = vpop.f32.mrf.mxu1 }
 0x186   :  { %4178 = vst [vmem:[#allocation37_spill] sm:$0xff] %v3711_v37 }
 0x187   :  { %v3713_v33 = vpop.f32.mrf.mxu0  ;;  %v3715_v32 = vpop.f32.mrf.mxu1 }
 0x188   :  { %4179 = vst [vmem:[#allocation38_spill] sm:$0xff] %v3715_v32  ;;  %v1346_v32 = vadd.f32 %v3036_v40, %v3605_v45  ;;  %v3746_v45 = vld [vmem:[#allocation7 + $0x150] sm:$0xff] }
 0x189   :  { %v3717_v50 = vpop.f32.mrf.mxu0  ;;  %v3721_v53 = vpop.f32.mrf.mxu1 }
 0x18a   :  { %4180 = vst [vmem:[#allocation39_spill] sm:$0xff] %v3717_v50  ;;  %4182 = vst [vmem:[#allocation41_spill] sm:$0xff] %v3721_v53  ;;  %v3100_v50 = vadd.f32 %v3099_v58, %v3098_v54  ;;  %v3094_v53 = vadd.f32 %v3093_v42, %v3092_v39  ;;  %v3748_v54 = vld [vmem:[#allocation7 + $0x170] sm:$0xff]  ;;  %v3042_v58 = vadd.f32 %v3041_v0, %v3040_v61 }
 0x18b   :  { %v3719_v49 = vpop.f32.mrf.mxu0  ;;  %v3727_v29 = vpop.f32.mrf.mxu1  ;;  %v2872_v39 = vcombine.low %v3739_v46, %v3741_v51  ;;  %v2864_v61 = vcombine.low %v3746_v45, %v3748_v54  ;;  %v3763_v0 = vld [vmem:[#allocation7 + $0x130] sm:$0xff]  ;;  %v4209_v46 = vld [vmem:[#allocation25_spill] sm:$0xff] }
 0x18c   :  { %4181 = vst [vmem:[#allocation40_spill] sm:$0xff] %v3719_v49  ;;  %v1443_v40 = vadd.f32 %v3100_v50, %v1346_v32  ;;  %v1446_v32 = vadd.f32 %v3103_v38, %v1349_v34  ;;  %v1354_v9 = vadd.f32 %v3042_v58, %v3619_v1  ;;  %v2857_v38 = vcombine.high %v3761_v63, %v3763_v0 }
 0x18d   :  { %v3723_v8 = vpop.f32.mrf.mxu0  ;;  %v3734_v56 = vpop.f32.mrf.mxu1 }
 0x18e   :  { %4183 = vst [vmem:[#allocation42_spill] sm:$0xff] %v3723_v8  ;;  %4185 = vst [vmem:[#allocation44_spill] sm:$0xff] %v3734_v56  ;;  %v1338_v8 = vadd.f32 %v3030_v24, %v3597_v23 }
 0x18f   :  { %v3725_v28 = vpop.f32.mrf.mxu0  ;;  %v3750_v56 = vpop.f32.mrf.mxu1 }
 0x190   :  { %4184 = vst [vmem:[#allocation43_spill] sm:$0xff] %v3725_v28  ;;  %v3033_v28 = vadd.f32 %v3032_v43, %v3031_v41  ;;  %v1435_v42 = vadd.f32 %v3094_v53, %v1338_v8  ;;  %v3051_v43 = vadd.f32 %v3050_v16, %v3049_v14  ;;  %v1685_v53 = vld [vmem:[#allocation7 + $0x198] sm:$0xff]  ;;  %v3045_v14 = vadd.f32 %v3675_v6, %v3671_v3 }
 0x191   :  { %v3729_v31 = vpop.f32.mrf.mxu0  ;;  %v1689_v8 = vld [vmem:[#allocation7 + $0x1b8] sm:$0xff]  ;;  %v3772_v16 = vpop.f32.mrf.mxu1  ;;  %v3060_v3 = vadd.f32 %v3705_v17, %v3701_v52  ;;  %v1451_v17 = vadd.f32 %v3106_v12, %v1354_v9  ;;  %v4189_v12 = vld [vmem:[#allocation30_spill] sm:$0xff] }
 0x192   :  { %v1341_v41 = vadd.f32 %v3033_v28, %v3600_v36  ;;  %v1362_v36 = vadd.f32 %v3048_v59, %v3625_v18  ;;  %v3112_v28 = vadd.f32 %v3111_v15, %v3681_v13  ;;  %v2865_v18 = vcombine.high %v3746_v45, %v3748_v54 }
 0x193   :  { %v3731_v37 = vpop.f32.mrf.mxu0  ;;  %v1365_v1 = vadd.f32 %v3051_v43, %v3628_v27  ;;  %v3783_v6 = vcombine.low %v1685_v53, %v1689_v8  ;;  %v1200_v59 = vadd.f32 %v3651_v25, %v3594_v5  ;;  %v1357_v27 = vadd.f32 %v3045_v14, %v3622_v10  ;;  %v3134_v21 = vpop.f32.mrf.mxu1  ;;  %v1677_v43 = vld [vmem:[#allocation7 + $0x158] sm:$0xff] }
 0x194   :  { %v1438_v34 = vadd.f32 %v3097_v57, %v1341_v41  ;;  %v3008_v41 = vadd.f32 %v3657_v30, %v3653_v26  ;;  %v3109_v57 = vadd.f32 %v3679_v11, %v3677_v7  ;;  %v1378_v26 = vadd.f32 %v3060_v3, %v3642_v62  ;;  %v4190_v14 = vld [vmem:[#allocation32_spill] sm:$0xff] }
 0x195   :  { %v3736_v49 = vpop.f32.mrf.mxu0  ;;  %v3063_v10 = vadd.f32 %v3713_v33, %v3709_v48  ;;  %v1462_v20 = vadd.f32 %v3115_v2, %v1365_v1  ;;  %v3799_v22 = vcombine.high %v1685_v53, %v1689_v8  ;;  %v3118_v62 = vadd.f32 %v4190_v14, %v4189_v12  ;;  %v3135_v33 = vpop.f32.mrf.mxu1  ;;  %v4193_v3 = vld [vmem:[#allocation24_spill] sm:$0xff] }
 0x196   :  { %v1297_v8 = vadd.f32 %v3008_v41, %v1200_v59  ;;  %v4199_v41 = vmov 0   ;;  %v3133_v45 = vadd.f32 %v3772_v16, %v3750_v56 }
 0x197   :  { %v3744_v55 = vpop.f32.mrf.mxu0  ;;  %v3137_v14 = vpop.f32.mrf.mxu1 }
 0x199   :  { %v3174_v23 = vpop.f32.mrf.mxu0 }
 0x19a   :  { %v1540_v35 = vadd.f32 %v3174_v23, %v1443_v40  ;;  %v1459_v23 = vadd.f32 %v3112_v28, %v1362_v36  ;;  %v4187_v36 = vld [vmem:[#allocation37_spill] sm:$0xff] }
 0x19b   :  { %v1531_v50 = vpop.f32.mrf.mxu0 }
 0x19c   :  { %v1596_v44 = vmax.f32 %v1540_v35, 0.0  ;;  %v1532_v47 = vadd.f32 %v1531_v50, %v1435_v42  ;;  %v1681_v50 = vld [vmem:[#allocation7 + $0x178] sm:$0xff] }
 0x19d   :  { %v3175_v24 = vpop.f32.mrf.mxu0  ;;  %v3810_v53 = vcombine.high %v1677_v43, %v1681_v50 }
 0x19e   :  { %1612 = vst [vmem:[#allocation10 + $0x10] sm:$0xff] %v1596_v44  ;;  %v1594_v13 = vmax.f32 %v1532_v47, 0.0  ;;  %v1543_v15 = vadd.f32 %v3175_v24, %v1446_v32  ;;  %v4186_v32 = vld [vmem:[#allocation36_spill] sm:$0xff]  ;;  %v4191_v24 = vld [vmem:[#allocation31_spill] sm:$0xff] }
 0x19f   :  { %v1534_v4 = vpop.f32.mrf.mxu0  ;;  %v3124_v28 = vadd.f32 %v4187_v36, %v4186_v32  ;;  %v4188_v47 = vld [vmem:[#allocation20_spill] sm:$0xff]  ;;  %v4203_v32 = vld [vmem:[#allocation21_spill] sm:$0xff] }
 0x1a0   :  { %1610 = vst [vmem:[#allocation10] sm:$0xff] %v1594_v13  ;;  %v1597_v40 = vmax.f32 %v1543_v15, 0.0  ;;  %v1535_v58 = vadd.f32 %v1534_v4, %v1438_v34  ;;  %v1370_v9 = vadd.f32 %v3054_v19, %v4188_v47  ;;  %v4192_v15 = vld [vmem:[#allocation33_spill] sm:$0xff]  ;;  %v1381_v4 = vadd.f32 %v3063_v10, %v4193_v3  ;;  %v4205_v47 = vld [vmem:[#allocation40_spill] sm:$0xff] }
 0x1a1   :  { %v3178_v52 = vpop.f32.mrf.mxu0  ;;  %v3057_v48 = vadd.f32 %v4192_v15, %v4191_v24  ;;  %v3072_v19 = vadd.f32 %v3731_v37, %v3729_v31  ;;  %v1475_v10 = vadd.f32 %v3124_v28, %v1378_v26  ;;  %v4201_v37 = vld [vmem:[#allocation28_spill] sm:$0xff]  ;;  %v4202_v31 = vld [vmem:[#allocation29_spill] sm:$0xff]  ;;  %v4206_v15 = vld [vmem:[#allocation23_spill] sm:$0xff] }
 0x1a2   :  { %1613 = vst [vmem:[#allocation10 + $0x18] sm:$0xff] %v1597_v40  ;;  %v3794_v25 = vpack.c.bf16 %v1597_v40, %v1596_v44  ;;  %v1595_v35 = vmax.f32 %v1535_v58, 0.0  ;;  %v1556_v42 = vadd.f32 %v3178_v52, %v1459_v23  ;;  %v4194_v40 = vld [vmem:[#allocation38_spill] sm:$0xff]  ;;  %v4195_v58 = vld [vmem:[#allocation41_spill] sm:$0xff]  ;;  %v1467_v24 = vadd.f32 %v3118_v62, %v1370_v9  ;;  %v4208_v28 = vld [vmem:[#allocation35_spill] sm:$0xff] }
 0x1a3   :  { %v1547_v30 = vpop.f32.mrf.mxu0  ;;  %v3127_v23 = vadd.f32 %v4195_v58, %v4194_v40  ;;  %v1373_v36 = vadd.f32 %v3057_v48, %v4203_v32  ;;  %v4207_v26 = vld [vmem:[#allocation34_spill] sm:$0xff]  ;;  %v1669_v3 = vld [vmem:[#allocation7 + $0x118] sm:$0xff]  ;;  %v1394_v40 = vadd.f32 %v3072_v19, %v1297_v8  ;;  %v3136_v58 = vadd.f32 %v3135_v33, %v3134_v21  ;;  %v3852_v21 = vld [vmem:[#allocation7 + $0xd0] sm:$0xff]  ;;  %v3138_v8 = vpop.f32.mrf.mxu1 }
 0x1a4   :  { %1611 = vst [vmem:[#allocation10 + $0x8] sm:$0xff] %v1595_v35  ;;  %v3803_v7 = vpack.c.bf16 %v1595_v35, %v1594_v13  ;;  %v1600_v11 = vmax.f32 %v1556_v42, 0.0  ;;  %v1548_v44 = vadd.f32 %v1547_v30, %v1451_v17  ;;  %v1454_v13 = vadd.f32 %v3109_v57, %v1357_v27  ;;  %v4196_v17 = vld [vmem:[#allocation18_spill] sm:$0xff]  ;;  %v4197_v35 = vld [vmem:[#allocation19_spill] sm:$0xff]  ;;  %v1673_v48 = vld [vmem:[#allocation7 + $0x138] sm:$0xff] }
 0x1a5   :  { %v3179_v34 = vpop.f32.mrf.mxu0  ;;  %v4198_v59 = vcombine.low %v4196_v17, %v4197_v35  ;;  %v4200_v42 = vld [vmem:[#allocation27_spill] sm:$0xff]  ;;  %v1478_v17 = vadd.f32 %v3127_v23, %v1381_v4  ;;  %v3843_v9 = vcombine.low %v1677_v43, %v1681_v50  ;;  %v4211_v50 = vld [vmem:[#allocation42_spill] sm:$0xff]  ;;  %v3862_v4 = vcombine.high %v1669_v3, %v1673_v48  ;;  %v1661_v32 = vld [vmem:[#allocation7 + $0xd8] sm:$0xff] }
 0x1a6   :  { %1616 = vst [vmem:[#allocation10 + $0x30] sm:$0xff] %v1600_v11  ;;  %v1598_v1 = vmax.f32 %v1548_v44, 0.0  ;;  %v1559_v2 = vadd.f32 %v3179_v34, %v1462_v20  ;;  %2093 = vmatmul.mubr.bf16.vlgmr.msra.gmra.mxu1 %v3803_v7  ;;  %2206 = vmatmul.mubr.bf16.vlgmr.msra.gmra.mxu0 %v3803_v7  ;;  %v1203_v30 = vadd.f32 %v4200_v42, %v3594_v5  ;;  %v4204_v44 = vld [vmem:[#allocation39_spill] sm:$0xff] }
 0x1a7   :  { %v1550_v52 = vpop.f32.mrf.mxu0  ;;  %2287 = vmatpush1.bf16.msra.mxu1 %v4198_v59  ;;  %2102 = vmatprep.mubr.bf16.mxu1 %v4199_v41  ;;  %v3011_v20 = vadd.f32 %v4202_v31, %v4201_v37  ;;  %v3066_v12 = vadd.f32 %v4205_v47, %v4204_v44  ;;  %v3121_v34 = vadd.f32 %v4208_v28, %v4207_v26  ;;  %v3854_v33 = vld [vmem:[#allocation7 + $0xf0] sm:$0xff]  ;;  %v4213_v44 = vld [vmem:[#allocation26_spill] sm:$0xff] }
 0x1a8   :  { %1614 = vst [vmem:[#allocation10 + $0x20] sm:$0xff] %v1598_v1  ;;  %v1601_v27 = vmax.f32 %v1559_v2, 0.0  ;;  %v1551_v57 = vadd.f32 %v1550_v52, %v1454_v13  ;;  %2215 = vmatprep.mubr.bf16.mxu0 %v4199_v41  ;;  %2288 = vmatprep.subr.bf16.mxu1 %v2873_v60  ;;  %v3139_v37 = vadd.f32 %v3138_v8, %v3137_v14  ;;  %v1652_v26 = vld [vmem:[#allocation7 + $0x90] sm:$0xff] }
 0x1a9   :  { %v3182_v5 = vpop.f32.mrf.mxu0  ;;  %2400 = vmatpush1.bf16.msra.mxu0 %v4206_v15  ;;  %v1386_v51 = vadd.f32 %v3066_v12, %v4209_v46  ;;  %v1300_v23 = vadd.f32 %v3011_v20, %v1203_v30  ;;  %v1470_v42 = vadd.f32 %v3121_v34, %v1373_v36  ;;  %v2849_v30 = vcombine.high %v3852_v21, %v3854_v33  ;;  %v1665_v36 = vld [vmem:[#allocation7 + $0xf8] sm:$0xff]  ;;  %v1656_v28 = vld [vmem:[#allocation7 + $0xb0] sm:$0xff] }
 0x1aa   :  { %1617 = vst [vmem:[#allocation10 + $0x38] sm:$0xff] %v1601_v27  ;;  %v3837_v2 = vpack.c.bf16 %v1601_v27, %v1600_v11  ;;  %v1599_v60 = vmax.f32 %v1551_v57, 0.0  ;;  %v1572_v13 = vadd.f32 %v3182_v5, %v1475_v10  ;;  %2401 = vmatprep.subr.bf16.mxu0 %v3799_v22  ;;  %v3075_v11 = vadd.f32 %v3744_v55, %v3736_v49  ;;  %v4212_v49 = vld [vmem:[#allocation43_spill] sm:$0xff] }
 0x1ab   :  { %v1563_v52 = vpop.f32.mrf.mxu0  ;;  %2289 = vmatpush1.bf16.msra.mxu1 %v2872_v39  ;;  %v4210_v39 = vld [vmem:[#allocation44_spill] sm:$0xff]  ;;  %v3069_v55 = vadd.f32 %v4212_v49, %v4211_v50  ;;  %v2856_v57 = vcombine.low %v3761_v63, %v3763_v0  ;;  %v3881_v14 = vcombine.low %v1669_v3, %v1673_v48  ;;  %v2848_v63 = vcombine.low %v3852_v21, %v3854_v33 }
 0x1ac   :  { %1615 = vst [vmem:[#allocation10 + $0x28] sm:$0xff] %v1599_v60  ;;  %v3847_v62 = vpack.c.bf16 %v1599_v60, %v1598_v1  ;;  %v1604_v35 = vmax.f32 %v1572_v13, 0.0  ;;  %v1564_v59 = vadd.f32 %v1563_v52, %v1467_v24  ;;  %2290 = vmatprep.subr.bf16.mxu1 %v2865_v18  ;;  %v3130_v43 = vadd.f32 %v4210_v39, %v3727_v29  ;;  %v1657_v60 = vld [vmem:[#allocation7 + $0xb8] sm:$0xff] }
 0x1ad   :  { %v3183_v1 = vpop.f32.mrf.mxu0  ;;  %2402 = vmatpush1.bf16.msra.mxu0 %v3783_v6  ;;  %v1491_v29 = vadd.f32 %v3136_v58, %v1394_v40  ;;  %v1397_v10 = vadd.f32 %v3075_v11, %v1300_v23  ;;  %v1389_v47 = vadd.f32 %v3069_v55, %v4213_v44  ;;  %v3890_v0 = vcombine.high %v1661_v32, %v1665_v36  ;;  %v1645_v49 = vld [vmem:[#allocation7 + $0x58] sm:$0xff]  ;;  %v1636_v23 = vld [vmem:[#allocation7 + $0x10] sm:$0xff] }
 0x1ae   :  { %1620 = vst [vmem:[#allocation10 + $0x50] sm:$0xff] %v1604_v35  ;;  %v1602_v18 = vmax.f32 %v1564_v59, 0.0  ;;  %v1575_v19 = vadd.f32 %v3183_v1, %v1478_v17  ;;  %2103 = vmatmul.mubr.bf16.gmra.mxu1 %v3794_v25  ;;  %2216 = vmatmul.mubr.bf16.gmra.mxu0 %v3794_v25  ;;  %v1483_v5 = vadd.f32 %v3130_v43, %v1386_v51  ;;  %v1648_v59 = vld [vmem:[#allocation7 + $0x70] sm:$0xff]  ;;  %v1649_v55 = vld [vmem:[#allocation7 + $0x78] sm:$0xff] }
 0x1af   :  { %v1566_v27 = vpop.f32.mrf.mxu0  ;;  %2112 = vmatprep.mubr.bf16.mxu1 %v4199_v41  ;;  %2225 = vmatprep.mubr.bf16.mxu0 %v4199_v41  ;;  %v1494_v3 = vadd.f32 %v3139_v37, %v1397_v10  ;;  %v2841_v40 = vcombine.high %v1652_v26, %v1656_v28  ;;  %v3895_v58 = vcombine.low %v1661_v32, %v1665_v36  ;;  %v4214_v32 = vld [vmem:[#allocation22_spill] sm:$0xff] }
 0x1b0   :  { %1618 = vst [vmem:[#allocation10 + $0x40] sm:$0xff] %v1602_v18  ;;  %v1605_v31 = vmax.f32 %v1575_v19, 0.0  ;;  %v1567_v20 = vadd.f32 %v1566_v27, %v1470_v42  ;;  %2291 = vmatpush1.bf16.msra.mxu1 %v2864_v61  ;;  %2403 = vmatprep.subr.bf16.mxu0 %v3810_v53  ;;  %v1486_v11 = vadd.f32 %v3133_v45, %v1389_v47  ;;  %v1637_v19 = vld [vmem:[#allocation7 + $0x18] sm:$0xff] }
 0x1b1   :  { %v3186_v12 = vpop.f32.mrf.mxu0  ;;  %2292 = vmatprep.subr.bf16.mxu1 %v2857_v38  ;;  %2404 = vmatpush1.bf16.msra.mxu0 %v3843_v9  ;;  %v1653_v38 = vld [vmem:[#allocation7 + $0x98] sm:$0xff]  ;;  %v2840_v39 = vcombine.low %v1652_v26, %v1656_v28  ;;  %v2834_v10 = vcombine.low %v1645_v49, %v1649_v55 }
 0x1b2   :  { %1621 = vst [vmem:[#allocation10 + $0x58] sm:$0xff] %v1605_v31  ;;  %v3885_v54 = vpack.c.bf16 %v1605_v31, %v1604_v35  ;;  %v1603_v61 = vmax.f32 %v1567_v20, 0.0  ;;  %v1588_v24 = vadd.f32 %v3186_v12, %v1491_v29  ;;  %2405 = vmatprep.subr.bf16.mxu0 %v3862_v4  ;;  %v1644_v35 = vld [vmem:[#allocation7 + $0x50] sm:$0xff]  ;;  %v3899_v21 = vcombine.high %v1653_v38, %v1657_v60  ;;  %v1641_v42 = vld [vmem:[#allocation7 + $0x38] sm:$0xff] }
 0x1b3   :  { %v1579_v34 = vpop.f32.mrf.mxu0  ;;  %v2833_v43 = vcombine.high %v1644_v35, %v1648_v59  ;;  %v3905_v50 = vcombine.low %v1653_v38, %v1657_v60  ;;  %v2832_v29 = vcombine.low %v1644_v35, %v1648_v59  ;;  %v2827_v37 = vcombine.high %v1637_v19, %v1641_v42 }
 0x1b4   :  { %1619 = vst [vmem:[#allocation10 + $0x48] sm:$0xff] %v1603_v61  ;;  %v3892_v13 = vpack.c.bf16 %v1603_v61, %v1602_v18  ;;  %v1608_v56 = vmax.f32 %v1588_v24, 0.0  ;;  %v1580_v16 = vadd.f32 %v1579_v34, %v1483_v5  ;;  %2293 = vmatpush1.bf16.msra.mxu1 %v2856_v57  ;;  %v1640_v18 = vld [vmem:[#allocation7 + $0x30] sm:$0xff]  ;;  %v2835_v57 = vcombine.high %v1645_v49, %v1649_v55 }
 0x1b5   :  { %v3187_v48 = vpop.f32.mrf.mxu0  ;;  %2294 = vmatprep.subr.bf16.mxu1 %v2849_v30  ;;  %2406 = vmatpush1.bf16.msra.mxu0 %v3881_v14  ;;  %v2825_v30 = vcombine.high %v1636_v23, %v1640_v18  ;;  %v2824_v31 = vcombine.low %v1636_v23, %v1640_v18  ;;  %v2826_v20 = vcombine.low %v1637_v19, %v1641_v42 }
 0x1b6   :  { %1624 = vst [vmem:[#allocation10 + $0x70] sm:$0xff] %v1608_v56  ;;  %v1606_v52 = vmax.f32 %v1580_v16, 0.0  ;;  %v1591_v17 = vadd.f32 %v3187_v48, %v1494_v3  ;;  %2113 = vmatmul.mubr.bf16.gmra.mxu1 %v3847_v62  ;;  %2226 = vmatmul.mubr.bf16.gmra.mxu0 %v3847_v62 }
 0x1b7   :  { %v1582_v33 = vpop.f32.mrf.mxu0  ;;  %2122 = vmatprep.mubr.bf16.mxu1 %v4199_v41  ;;  %2235 = vmatprep.mubr.bf16.mxu0 %v4199_v41 }
 0x1b8   :  { %1622 = vst [vmem:[#allocation10 + $0x60] sm:$0xff] %v1606_v52  ;;  %v1609_v46 = vmax.f32 %v1591_v17, 0.0  ;;  %v1583_v51 = vadd.f32 %v1582_v33, %v1486_v11  ;;  %2295 = vmatpush1.bf16.msra.mxu1 %v2848_v63  ;;  %2407 = vmatprep.subr.bf16.mxu0 %v3890_v0 }
 0x1b9   :  { %2296 = vmatprep.subr.bf16.mxu1 %v2841_v40  ;;  %2408 = vmatpush1.bf16.msra.mxu0 %v3895_v58 }
 0x1ba   :  { %1625 = vst [vmem:[#allocation10 + $0x78] sm:$0xff] %v1609_v46  ;;  %v3907_v8 = vpack.c.bf16 %v1609_v46, %v1608_v56  ;;  %v1607_v1 = vmax.f32 %v1583_v51, 0.0  ;;  %2409 = vmatprep.subr.bf16.mxu0 %v3899_v21 }
 0x1bc   :  { %1623 = vst [vmem:[#allocation10 + $0x68] sm:$0xff] %v1607_v1  ;;  %v3910_v27 = vpack.c.bf16 %v1607_v1, %v1606_v52  ;;  %2297 = vmatpush1.bf16.msra.mxu1 %v2840_v39 }
 0x1bd   :  { %2298 = vmatprep.subr.bf16.mxu1 %v2833_v43  ;;  %2410 = vmatpush1.bf16.msra.mxu0 %v3905_v50 }
 0x1be   :  { %2123 = vmatmul.mubr.bf16.gmra.mxu1 %v3837_v2  ;;  %2236 = vmatmul.mubr.bf16.gmra.mxu0 %v3837_v2 }
 0x1bf   :  { %2132 = vmatprep.mubr.bf16.mxu1 %v4199_v41  ;;  %2245 = vmatprep.mubr.bf16.mxu0 %v4199_v41 }
 0x1c0   :  { %2299 = vmatpush1.bf16.msra.mxu1 %v2832_v29  ;;  %2411 = vmatprep.subr.bf16.mxu0 %v2835_v57 }
 0x1c1   :  { %2300 = vmatprep.subr.bf16.mxu1 %v2825_v30  ;;  %2412 = vmatpush1.bf16.msra.mxu0 %v2834_v10 }
 0x1c2   :  { %2413 = vmatprep.subr.bf16.mxu0 %v2827_v37 }
 0x1c4   :  { %2301 = vmatpush1.bf16.msra.mxu1 %v2824_v31 }
 0x1c5   :  { %2414 = vmatpush1.bf16.msra.mxu0 %v2826_v20  ;;  %3188 = vmatprep.subr.bf16.mxu1 %v4214_v32 }
 0x1c6   :  { %2133 = vmatmul.mubr.bf16.gmra.mxu1 %v3892_v13  ;;  %2246 = vmatmul.mubr.bf16.gmra.mxu0 %v3892_v13 }
 0x1c7   :  { %2142 = vmatprep.mubr.bf16.mxu1 %v4199_v41  ;;  %2255 = vmatprep.mubr.bf16.mxu0 %v4199_v41 }
 0x1ce   :  { %2143 = vmatmul.mubr.bf16.gmra.mxu1 %v3885_v54  ;;  %2256 = vmatmul.mubr.bf16.gmra.mxu0 %v3885_v54 }
 0x1cf   :  { %2152 = vmatprep.mubr.bf16.mxu1 %v4199_v41  ;;  %2265 = vmatprep.mubr.bf16.mxu0 %v4199_v41 }
 0x1d6   :  { %2153 = vmatmul.mubr.bf16.gmra.mxu1 %v3910_v27  ;;  %2266 = vmatmul.mubr.bf16.gmra.mxu0 %v3910_v27 }
 0x1d7   :  { %2162 = vmatprep.mubr.bf16.mxu1 %v4199_v41  ;;  %2275 = vmatprep.mubr.bf16.mxu0 %v4199_v41 }
 0x1de   :  { %2163 = vmatmul.mubr.bf16.gmra.mxu1 %v3907_v8  ;;  %2276 = vmatmul.mubr.bf16.gmra.mxu0 %v3907_v8 }
 0x1df   :  { %2318 = vmatprep.mubr.bf16.mxu1 %v4199_v41  ;;  %2431 = vmatprep.mubr.bf16.mxu0 %v4199_v41 }
 0x1e6   :  { %2319 = vmatmul.mubr.bf16.vlgmr.msra.gmra.mxu1 %v3803_v7  ;;  %2432 = vmatmul.mubr.bf16.vlgmr.msra.gmra.mxu0 %v3803_v7 }
 0x1e7   :  { %3196 = vmatpush1.bf16.msra.mxu1 %v4206_v15  ;;  %2328 = vmatprep.mubr.bf16.mxu1 %v4199_v41 }
 0x1e8   :  { %2441 = vmatprep.mubr.bf16.mxu0 %v4199_v41  ;;  %3189 = vmatprep.subr.bf16.mxu1 %v3799_v22 }
 0x1eb   :  { %3197 = vmatpush1.bf16.msra.mxu1 %v3783_v6  ;;  %v1700_v6 = vlaneseq }
 0x1ec   :  { %3190 = vmatprep.subr.bf16.mxu1 %v3810_v53  ;;  %v3979_v53 = vld [vmem:[#allocation8] sm:$0xff] }
 0x1ee   :  { %2329 = vmatmul.mubr.bf16.gmra.mxu1 %v3794_v25  ;;  %2442 = vmatmul.mubr.bf16.gmra.mxu0 %v3794_v25  ;;  %v3975_v25 = vshrl.u32 %v1700_v6, 7 }
 0x1ef   :  { %2338 = vmatprep.mubr.bf16.mxu1 %v4199_v41  ;;  %2451 = vmatprep.mubr.bf16.mxu0 %v4199_v41 }
 0x1f0   :  { %3198 = vmatpush1.bf16.msra.mxu1 %v3843_v9  ;;  %v1702_v22 = vsub.s32 0, %v3975_v25  ;;  %v1710_v7 = vsub.s32 2, %v3975_v25  ;;  %v1706_v15 = vsub.s32 1, %v3975_v25 }
 0x1f1   :  { %3191 = vmatprep.subr.bf16.mxu1 %v3862_v4 }
 0x1f2   :  { %v3984_v9 = vrot.slane %v3979_v53, %v1702_v22 }
 0x1f4   :  { %3199 = vmatpush1.bf16.msra.mxu1 %v3881_v14 }
 0x1f5   :  { %3192 = vmatprep.subr.bf16.mxu1 %v3890_v0 }
 0x1f6   :  { %2339 = vmatmul.mubr.bf16.gmra.mxu1 %v3847_v62  ;;  %2452 = vmatmul.mubr.bf16.gmra.mxu0 %v3847_v62  ;;  %v3990_v62 = vrot.slane %v3979_v53, %v1706_v15 }
 0x1f7   :  { %2348 = vmatprep.mubr.bf16.mxu1 %v4199_v41  ;;  %2461 = vmatprep.mubr.bf16.mxu0 %v4199_v41 }
 0x1f8   :  { %3200 = vmatpush1.bf16.msra.mxu1 %v3895_v58 }
 0x1f9   :  { %3193 = vmatprep.subr.bf16.mxu1 %v3899_v21 }
 0x1fc   :  { %3201 = vmatpush1.bf16.msra.mxu1 %v3905_v50 }
 0x1fd   :  { %3194 = vmatprep.subr.bf16.mxu1 %v2835_v57 }
 0x1fe   :  { %2349 = vmatmul.mubr.bf16.gmra.mxu1 %v3837_v2  ;;  %2462 = vmatmul.mubr.bf16.gmra.mxu0 %v3837_v2  ;;  %v1714_v2 = vsub.s32 3, %v3975_v25 }
 0x1ff   :  { %2358 = vmatprep.mubr.bf16.mxu1 %v4199_v41  ;;  %2471 = vmatprep.mubr.bf16.mxu0 %v4199_v41 }
 0x200   :  { %3202 = vmatpush1.bf16.msra.mxu1 %v2834_v10  ;;  %v3993_v4 = vrot.slane %v3979_v53, %v1714_v2 }
 0x201   :  { %3195 = vmatprep.subr.bf16.mxu1 %v2827_v37 }
 0x204   :  { %3203 = vmatpush1.bf16.msra.mxu1 %v2826_v20 }
 0x206   :  { %2359 = vmatmul.mubr.bf16.gmra.mxu1 %v3892_v13  ;;  %2472 = vmatmul.mubr.bf16.gmra.mxu0 %v3892_v13 }
 0x207   :  { %2368 = vmatprep.mubr.bf16.mxu1 %v4199_v41  ;;  %2481 = vmatprep.mubr.bf16.mxu0 %v4199_v41 }
 0x20e   :  { %2369 = vmatmul.mubr.bf16.gmra.mxu1 %v3885_v54  ;;  %2482 = vmatmul.mubr.bf16.gmra.mxu0 %v3885_v54 }
 0x20f   :  { %2378 = vmatprep.mubr.bf16.mxu1 %v4199_v41 }
 0x216   :  { %2379 = vmatmul.mubr.bf16.gmra.mxu1 %v3910_v27 }
 0x217   :  { %2388 = vmatprep.mubr.bf16.mxu1 %v4199_v41 }
 0x21e   :  { %2389 = vmatmul.mubr.bf16.gmra.mxu1 %v3907_v8 }
 0x21f   :  { %2491 = vmatprep.mubr.bf16.mxu1 %v4199_v41 }
 0x226   :  { %2492 = vmatmul.mubr.bf16.vlgmr.msra.gmra.mxu1 %v3910_v27 }
 0x227   :  { %2501 = vmatprep.mubr.bf16.mxu1 %v4199_v41  ;;  %v3987_v41 = vrot.slane %v3979_v53, %v1710_v7 }
 0x22e   :  { %2502 = vmatmul.mubr.bf16.gmra.mxu1 %v3907_v8 }
 0x266   :  { %v2094_v36 = vpop.f32.mrf.mxu1  ;;  %v2207_v44 = vpop.f32.mrf.mxu0 }
 0x267   :  { %v2095_v47 = vadd.f32 %v2094_v36, %v3984_v9  ;;  %v2208_v12 = vadd.f32 %v2207_v44, %v3987_v41 }
 0x268   :  { %v2096_v5 = vpop.f32.mrf.mxu1  ;;  %v2209_v14 = vpop.f32.mrf.mxu0 }
 0x269   :  { %2512 = vst [vmem:[#allocation11] sm:$0xff] %v2095_v47  ;;  %2514 = vst [vmem:[#allocation11 + $0x10] sm:$0xff] %v2208_v12  ;;  %v2097_v45 = vadd.f32 %v2096_v5, %v3990_v62  ;;  %v2210_v54 = vadd.f32 %v2209_v14, %v3993_v4 }
 0x26a   :  { %v2098_v61 = vpop.f32.mrf.mxu1  ;;  %v2211_v24 = vpop.f32.mrf.mxu0 }
 0x26b   :  { %2513 = vst [vmem:[#allocation11 + $0x8] sm:$0xff] %v2097_v45  ;;  %2515 = vst [vmem:[#allocation11 + $0x18] sm:$0xff] %v2210_v54  ;;  %v2099_v26 = vadd.f32 %v2098_v61, %v3984_v9  ;;  %v2212_v28 = vadd.f32 %v2211_v24, %v3987_v41 }
 0x26c   :  { %v2100_v34 = vpop.f32.mrf.mxu1  ;;  %v2213_v63 = vpop.f32.mrf.mxu0 }
 0x26d   :  { %2520 = vst [vmem:[#allocation11 + $0x40] sm:$0xff] %v2099_v26  ;;  %2522 = vst [vmem:[#allocation11 + $0x50] sm:$0xff] %v2212_v28  ;;  %v2101_v0 = vadd.f32 %v2100_v34, %v3990_v62  ;;  %v2214_v38 = vadd.f32 %v2213_v63, %v3993_v4 }
 0x26e   :  { %v2104_v60 = vpop.f32.mrf.mxu1  ;;  %v2217_v13 = vpop.f32.mrf.mxu0 }
 0x26f   :  { %2521 = vst [vmem:[#allocation11 + $0x48] sm:$0xff] %v2101_v0  ;;  %2523 = vst [vmem:[#allocation11 + $0x58] sm:$0xff] %v2214_v38  ;;  %v2105_v56 = vadd.f32 %v2104_v60, %v3984_v9  ;;  %v2218_v16 = vadd.f32 %v2217_v13, %v3987_v41 }
 0x270   :  { %v2106_v3 = vpop.f32.mrf.mxu1  ;;  %v2219_v48 = vpop.f32.mrf.mxu0 }
 0x271   :  { %2528 = vst [vmem:[#allocation11 + $0x80] sm:$0xff] %v2105_v56  ;;  %2530 = vst [vmem:[#allocation11 + $0x90] sm:$0xff] %v2218_v16  ;;  %v2107_v40 = vadd.f32 %v2106_v3, %v3990_v62  ;;  %v2220_v58 = vadd.f32 %v2219_v48, %v3993_v4 }
 0x272   :  { %v2108_v52 = vpop.f32.mrf.mxu1  ;;  %v2221_v17 = vpop.f32.mrf.mxu0 }
 0x273   :  { %2529 = vst [vmem:[#allocation11 + $0x88] sm:$0xff] %v2107_v40  ;;  %2531 = vst [vmem:[#allocation11 + $0x98] sm:$0xff] %v2220_v58  ;;  %v2109_v11 = vadd.f32 %v2108_v52, %v3984_v9  ;;  %v2222_v35 = vadd.f32 %v2221_v17, %v3987_v41 }
 0x274   :  { %v2110_v59 = vpop.f32.mrf.mxu1  ;;  %v2223_v21 = vpop.f32.mrf.mxu0 }
 0x275   :  { %2536 = vst [vmem:[#allocation11 + $0xc0] sm:$0xff] %v2109_v11  ;;  %2538 = vst [vmem:[#allocation11 + $0xd0] sm:$0xff] %v2222_v35  ;;  %v2111_v33 = vadd.f32 %v2110_v59, %v3990_v62  ;;  %v2224_v46 = vadd.f32 %v2223_v21, %v3993_v4 }
 0x276   :  { %v2114_v51 = vpop.f32.mrf.mxu1  ;;  %v2227_v39 = vpop.f32.mrf.mxu0 }
 0x277   :  { %2537 = vst [vmem:[#allocation11 + $0xc8] sm:$0xff] %v2111_v33  ;;  %2539 = vst [vmem:[#allocation11 + $0xd8] sm:$0xff] %v2224_v46  ;;  %v2115_v43 = vadd.f32 %v2114_v51, %v3984_v9  ;;  %v2228_v50 = vadd.f32 %v2227_v39, %v3987_v41 }
 0x278   :  { %v2116_v49 = vpop.f32.mrf.mxu1  ;;  %v2229_v55 = vpop.f32.mrf.mxu0 }
 0x279   :  { %2544 = vst [vmem:[#allocation11 + $0x100] sm:$0xff] %v2115_v43  ;;  %2546 = vst [vmem:[#allocation11 + $0x110] sm:$0xff] %v2228_v50  ;;  %v2117_v8 = vadd.f32 %v2116_v49, %v3990_v62  ;;  %v2230_v1 = vadd.f32 %v2229_v55, %v3993_v4 }
 0x27a   :  { %3487 = shalt.err (!%p3484_p10)
}
 0x27b   :  { %s3538_s23 = smov 128   ;;  %s3539_s25 = smov 8   ;;  %v2118_v23 = vpop.f32.mrf.mxu1  ;;  %v2231_v18 = vpop.f32.mrf.mxu0  ;;  %2545 = vst [vmem:[#allocation11 + $0x108] sm:$0xff] %v2117_v8  ;;  %2547 = vst [vmem:[#allocation11 + $0x118] sm:$0xff] %v2230_v1 }
 0x27c   :  { %2651 = dma.vmem_to_hbm [thread:$0]  %s2646_s21, 2048, %s4151_s5, [#allocation4], %s3538_s23, %s3538_s23, %s3539_s25   ;;  %v2119_v19 = vadd.f32 %v2118_v23, %v3984_v9  ;;  %v2232_v42 = vadd.f32 %v2231_v18, %v3987_v41 }
 0x27d   :  { %v2120_v27 = vpop.f32.mrf.mxu1  ;;  %v2233_v29 = vpop.f32.mrf.mxu0  ;;  %s3540_s5 = smov [#allocation11]  }
 0x27e   :  { %2552 = vst [vmem:[#allocation11 + $0x140] sm:$0xff] %v2119_v19  ;;  %2554 = vst [vmem:[#allocation11 + $0x150] sm:$0xff] %v2232_v42  ;;  %v2121_v57 = vadd.f32 %v2120_v27, %v3990_v62  ;;  %v2234_v30 = vadd.f32 %v2233_v29, %v3993_v4  ;;  %s2657_s28 = sshll.u32 %s3540_s5, 4  ;;  %s2658_s28 = int_to_ptr.vmem [resolvable:$true] %s2657_s28 }
 0x27f   :  { %v2124_v10 = vpop.f32.mrf.mxu1  ;;  %v2237_v37 = vpop.f32.mrf.mxu0  ;;  %s3496_s29 = scalar_lea.vmem %s2658_s28, 16384  ;;  %p3501_p12 = scmp.lt.s32.totalorder %s2658_s28, %s2658_s28 }
 0x280   :  { %2553 = vst [vmem:[#allocation11 + $0x148] sm:$0xff] %v2121_v57  ;;  %2555 = vst [vmem:[#allocation11 + $0x158] sm:$0xff] %v2234_v30  ;;  %v2125_v31 = vadd.f32 %v2124_v10, %v3984_v9  ;;  %v2238_v20 = vadd.f32 %v2237_v37, %v3987_v41  ;;  %p3497_p11 = scmp.ne.s32.totalorder %s2658_s28, %s3496_s29  ;;  %p3502_p13 = scmp.lt.s32.totalorder %s3496_s29, %s3496_s29 }
 0x281   :  { %v2126_v32 = vpop.f32.mrf.mxu1  ;;  %v2239_v6 = vpop.f32.mrf.mxu0 }
 0x282   :  { %2560 = vst [vmem:[#allocation11 + $0x180] sm:$0xff] %v2125_v31  ;;  %2562 = vst [vmem:[#allocation11 + $0x190] sm:$0xff] %v2238_v20  ;;  %v2127_v22 = vadd.f32 %v2126_v32, %v3990_v62  ;;  %v2240_v7 = vadd.f32 %v2239_v6, %v3993_v4  ;;  %p3503_p0 = por %p3502_p13, %p3501_p12 }
 0x283   :  { %v2128_v15 = vpop.f32.mrf.mxu1  ;;  %v2241_v2 = vpop.f32.mrf.mxu0 }
 0x284   :  { %2561 = vst [vmem:[#allocation11 + $0x188] sm:$0xff] %v2127_v22  ;;  %2563 = vst [vmem:[#allocation11 + $0x198] sm:$0xff] %v2240_v7  ;;  %v2129_v36 = vadd.f32 %v2128_v15, %v3984_v9  ;;  %v2242_v44 = vadd.f32 %v2241_v2, %v3987_v41  ;;  %p3504_p1 = pnand %p3503_p0, %p3497_p11 }
 0x285   :  { %v2130_v47 = vpop.f32.mrf.mxu1  ;;  %v2243_v12 = vpop.f32.mrf.mxu0 }
 0x286   :  { %2568 = vst [vmem:[#allocation11 + $0x1c0] sm:$0xff] %v2129_v36  ;;  %2570 = vst [vmem:[#allocation11 + $0x1d0] sm:$0xff] %v2242_v44  ;;  %v2131_v5 = vadd.f32 %v2130_v47, %v3990_v62  ;;  %v2244_v14 = vadd.f32 %v2243_v12, %v3993_v4  ;;  %v1718_v36 = vsub.s32 4, %v3975_v25  ;;  %v1726_v44 = vsub.s32 6, %v3975_v25 }
 0x287   :  { %v2134_v45 = vpop.f32.mrf.mxu1  ;;  %v2247_v54 = vpop.f32.mrf.mxu0 }
 0x288   :  { %2569 = vst [vmem:[#allocation11 + $0x1c8] sm:$0xff] %v2131_v5  ;;  %2571 = vst [vmem:[#allocation11 + $0x1d8] sm:$0xff] %v2244_v14  ;;  %v2135_v61 = vadd.f32 %v2134_v45, %v3984_v9  ;;  %v2248_v24 = vadd.f32 %v2247_v54, %v3987_v41  ;;  %v1722_v45 = vsub.s32 5, %v3975_v25  ;;  %v1730_v54 = vsub.s32 7, %v3975_v25 }
 0x289   :  { %v2136_v26 = vpop.f32.mrf.mxu1  ;;  %v2249_v28 = vpop.f32.mrf.mxu0 }
 0x28a   :  { %2576 = vst [vmem:[#allocation11 + $0x200] sm:$0xff] %v2135_v61  ;;  %2578 = vst [vmem:[#allocation11 + $0x210] sm:$0xff] %v2248_v24  ;;  %v2137_v34 = vadd.f32 %v2136_v26, %v3990_v62  ;;  %v2250_v63 = vadd.f32 %v2249_v28, %v3993_v4 }
 0x28b   :  { %v2138_v0 = vpop.f32.mrf.mxu1  ;;  %v2251_v38 = vpop.f32.mrf.mxu0 }
 0x28c   :  { %2577 = vst [vmem:[#allocation11 + $0x208] sm:$0xff] %v2137_v34  ;;  %2579 = vst [vmem:[#allocation11 + $0x218] sm:$0xff] %v2250_v63  ;;  %v2139_v60 = vadd.f32 %v2138_v0, %v3984_v9  ;;  %v2252_v13 = vadd.f32 %v2251_v38, %v3987_v41  ;;  %v4065_v34 = vrot.slane %v3979_v53, %v1718_v36 }
 0x28d   :  { %v2140_v56 = vpop.f32.mrf.mxu1  ;;  %v2253_v16 = vpop.f32.mrf.mxu0  ;;  %v4068_v63 = vrot.slane %v3979_v53, %v1726_v44 }
 0x28e   :  { %2584 = vst [vmem:[#allocation11 + $0x240] sm:$0xff] %v2139_v60  ;;  %2586 = vst [vmem:[#allocation11 + $0x250] sm:$0xff] %v2252_v13  ;;  %v2141_v3 = vadd.f32 %v2140_v56, %v3990_v62  ;;  %v2254_v48 = vadd.f32 %v2253_v16, %v3993_v4  ;;  %v4073_v13 = vrot.slane %v3979_v53, %v1722_v45 }
 0x28f   :  { %v2144_v40 = vpop.f32.mrf.mxu1  ;;  %v2257_v58 = vpop.f32.mrf.mxu0 }
 0x290   :  { %2585 = vst [vmem:[#allocation11 + $0x248] sm:$0xff] %v2141_v3  ;;  %2587 = vst [vmem:[#allocation11 + $0x258] sm:$0xff] %v2254_v48  ;;  %v2145_v52 = vadd.f32 %v2144_v40, %v3984_v9  ;;  %v2258_v17 = vadd.f32 %v2257_v58, %v3987_v41 }
 0x291   :  { %v2146_v11 = vpop.f32.mrf.mxu1  ;;  %v2259_v35 = vpop.f32.mrf.mxu0 }
 0x292   :  { %2592 = vst [vmem:[#allocation11 + $0x280] sm:$0xff] %v2145_v52  ;;  %2594 = vst [vmem:[#allocation11 + $0x290] sm:$0xff] %v2258_v17  ;;  %v2147_v59 = vadd.f32 %v2146_v11, %v3990_v62  ;;  %v2260_v21 = vadd.f32 %v2259_v35, %v3993_v4 }
 0x293   :  { %v2148_v33 = vpop.f32.mrf.mxu1  ;;  %v2261_v46 = vpop.f32.mrf.mxu0 }
 0x294   :  { %2593 = vst [vmem:[#allocation11 + $0x288] sm:$0xff] %v2147_v59  ;;  %2595 = vst [vmem:[#allocation11 + $0x298] sm:$0xff] %v2260_v21  ;;  %v2149_v51 = vadd.f32 %v2148_v33, %v3984_v9  ;;  %v2262_v39 = vadd.f32 %v2261_v46, %v3987_v41 }
 0x295   :  { %v2150_v43 = vpop.f32.mrf.mxu1  ;;  %v2263_v50 = vpop.f32.mrf.mxu0 }
 0x296   :  { %2600 = vst [vmem:[#allocation11 + $0x2c0] sm:$0xff] %v2149_v51  ;;  %2602 = vst [vmem:[#allocation11 + $0x2d0] sm:$0xff] %v2262_v39  ;;  %v2151_v49 = vadd.f32 %v2150_v43, %v3990_v62  ;;  %v2264_v55 = vadd.f32 %v2263_v50, %v3993_v4 }
 0x297   :  { %v2154_v8 = vpop.f32.mrf.mxu1  ;;  %v2267_v1 = vpop.f32.mrf.mxu0 }
 0x298   :  { %2601 = vst [vmem:[#allocation11 + $0x2c8] sm:$0xff] %v2151_v49  ;;  %2603 = vst [vmem:[#allocation11 + $0x2d8] sm:$0xff] %v2264_v55  ;;  %v2155_v23 = vadd.f32 %v2154_v8, %v3984_v9  ;;  %v2268_v18 = vadd.f32 %v2267_v1, %v3987_v41 }
 0x299   :  { %v2156_v19 = vpop.f32.mrf.mxu1  ;;  %v2269_v42 = vpop.f32.mrf.mxu0 }
 0x29a   :  { %2608 = vst [vmem:[#allocation11 + $0x300] sm:$0xff] %v2155_v23  ;;  %2610 = vst [vmem:[#allocation11 + $0x310] sm:$0xff] %v2268_v18  ;;  %v2157_v27 = vadd.f32 %v2156_v19, %v3990_v62  ;;  %v2270_v29 = vadd.f32 %v2269_v42, %v3993_v4 }
 0x29b   :  { %v2158_v57 = vpop.f32.mrf.mxu1  ;;  %v2271_v30 = vpop.f32.mrf.mxu0 }
 0x29c   :  { %2609 = vst [vmem:[#allocation11 + $0x308] sm:$0xff] %v2157_v27  ;;  %2611 = vst [vmem:[#allocation11 + $0x318] sm:$0xff] %v2270_v29  ;;  %v2159_v10 = vadd.f32 %v2158_v57, %v3984_v9  ;;  %v2272_v37 = vadd.f32 %v2271_v30, %v3987_v41 }
 0x29d   :  { %v2160_v31 = vpop.f32.mrf.mxu1  ;;  %v2273_v20 = vpop.f32.mrf.mxu0 }
 0x29e   :  { %2616 = vst [vmem:[#allocation11 + $0x340] sm:$0xff] %v2159_v10  ;;  %2618 = vst [vmem:[#allocation11 + $0x350] sm:$0xff] %v2272_v37  ;;  %v2161_v32 = vadd.f32 %v2160_v31, %v3990_v62  ;;  %v2274_v6 = vadd.f32 %v2273_v20, %v3993_v4 }
 0x29f   :  { %v2164_v22 = vpop.f32.mrf.mxu1  ;;  %v2277_v7 = vpop.f32.mrf.mxu0 }
 0x2a0   :  { %2617 = vst [vmem:[#allocation11 + $0x348] sm:$0xff] %v2161_v32  ;;  %2619 = vst [vmem:[#allocation11 + $0x358] sm:$0xff] %v2274_v6  ;;  %v2165_v15 = vadd.f32 %v2164_v22, %v3984_v9  ;;  %v2278_v2 = vadd.f32 %v2277_v7, %v3987_v41 }
 0x2a1   :  { %v2166_v47 = vpop.f32.mrf.mxu1  ;;  %v2279_v12 = vpop.f32.mrf.mxu0 }
 0x2a2   :  { %2624 = vst [vmem:[#allocation11 + $0x380] sm:$0xff] %v2165_v15  ;;  %2626 = vst [vmem:[#allocation11 + $0x390] sm:$0xff] %v2278_v2  ;;  %v2167_v5 = vadd.f32 %v2166_v47, %v3990_v62  ;;  %v2280_v14 = vadd.f32 %v2279_v12, %v3993_v4 }
 0x2a3   :  { %v2168_v61 = vpop.f32.mrf.mxu1  ;;  %v2281_v24 = vpop.f32.mrf.mxu0 }
 0x2a4   :  { %2625 = vst [vmem:[#allocation11 + $0x388] sm:$0xff] %v2167_v5  ;;  %2627 = vst [vmem:[#allocation11 + $0x398] sm:$0xff] %v2280_v14  ;;  %v2169_v26 = vadd.f32 %v2168_v61, %v3984_v9  ;;  %v2282_v28 = vadd.f32 %v2281_v24, %v3987_v41  ;;  %v4076_v9 = vrot.slane %v3979_v53, %v1730_v54 }
 0x2a5   :  { %v2170_v0 = vpop.f32.mrf.mxu1  ;;  %v2283_v38 = vpop.f32.mrf.mxu0 }
 0x2a6   :  { %2632 = vst [vmem:[#allocation11 + $0x3c0] sm:$0xff] %v2169_v26  ;;  %2634 = vst [vmem:[#allocation11 + $0x3d0] sm:$0xff] %v2282_v28  ;;  %v2171_v25 = vadd.f32 %v2170_v0, %v3990_v62  ;;  %v2284_v60 = vadd.f32 %v2283_v38, %v3993_v4 }
 0x2a7   :  { %v2320_v41 = vpop.f32.mrf.mxu1  ;;  %v2433_v56 = vpop.f32.mrf.mxu0 }
 0x2a8   :  { %2633 = vst [vmem:[#allocation11 + $0x3c8] sm:$0xff] %v2171_v25  ;;  %2635 = vst [vmem:[#allocation11 + $0x3d8] sm:$0xff] %v2284_v60  ;;  %v2321_v16 = vadd.f32 %v2320_v41, %v4065_v34  ;;  %v2434_v3 = vadd.f32 %v2433_v56, %v4068_v63 }
 0x2a9   :  { %v2322_v48 = vpop.f32.mrf.mxu1  ;;  %v2435_v40 = vpop.f32.mrf.mxu0 }
 0x2aa   :  { %2516 = vst [vmem:[#allocation11 + $0x20] sm:$0xff] %v2321_v16  ;;  %2518 = vst [vmem:[#allocation11 + $0x30] sm:$0xff] %v2434_v3  ;;  %v2323_v62 = vadd.f32 %v2322_v48, %v4073_v13  ;;  %v2436_v4 = vadd.f32 %v2435_v40, %v4076_v9 }
 0x2ab   :  { %v2324_v58 = vpop.f32.mrf.mxu1  ;;  %v2437_v52 = vpop.f32.mrf.mxu0 }
 0x2ac   :  { %2517 = vst [vmem:[#allocation11 + $0x28] sm:$0xff] %v2323_v62  ;;  %2519 = vst [vmem:[#allocation11 + $0x38] sm:$0xff] %v2436_v4  ;;  %v2325_v53 = vadd.f32 %v2324_v58, %v4065_v34  ;;  %v2438_v17 = vadd.f32 %v2437_v52, %v4068_v63 }
 0x2ad   :  { %v2326_v11 = vpop.f32.mrf.mxu1  ;;  %v2439_v35 = vpop.f32.mrf.mxu0 }
 0x2ae   :  { %2524 = vst [vmem:[#allocation11 + $0x60] sm:$0xff] %v2325_v53  ;;  %2526 = vst [vmem:[#allocation11 + $0x70] sm:$0xff] %v2438_v17  ;;  %v2327_v59 = vadd.f32 %v2326_v11, %v4073_v13  ;;  %v2440_v21 = vadd.f32 %v2439_v35, %v4076_v9 }
 0x2af   :  { %v2330_v33 = vpop.f32.mrf.mxu1  ;;  %v2443_v46 = vpop.f32.mrf.mxu0 }
 0x2b0   :  { %2525 = vst [vmem:[#allocation11 + $0x68] sm:$0xff] %v2327_v59  ;;  %2527 = vst [vmem:[#allocation11 + $0x78] sm:$0xff] %v2440_v21  ;;  %v2331_v51 = vadd.f32 %v2330_v33, %v4065_v34  ;;  %v2444_v39 = vadd.f32 %v2443_v46, %v4068_v63 }
 0x2b1   :  { %v2332_v43 = vpop.f32.mrf.mxu1  ;;  %v2445_v50 = vpop.f32.mrf.mxu0 }
 0x2b2   :  { %2532 = vst [vmem:[#allocation11 + $0xa0] sm:$0xff] %v2331_v51  ;;  %2534 = vst [vmem:[#allocation11 + $0xb0] sm:$0xff] %v2444_v39  ;;  %v2333_v49 = vadd.f32 %v2332_v43, %v4073_v13  ;;  %v2446_v55 = vadd.f32 %v2445_v50, %v4076_v9 }
 0x2b3   :  { %v2334_v8 = vpop.f32.mrf.mxu1  ;;  %v2447_v1 = vpop.f32.mrf.mxu0 }
 0x2b4   :  { %2533 = vst [vmem:[#allocation11 + $0xa8] sm:$0xff] %v2333_v49  ;;  %2535 = vst [vmem:[#allocation11 + $0xb8] sm:$0xff] %v2446_v55  ;;  %v2335_v23 = vadd.f32 %v2334_v8, %v4065_v34  ;;  %v2448_v18 = vadd.f32 %v2447_v1, %v4068_v63 }
 0x2b5   :  { %v2336_v19 = vpop.f32.mrf.mxu1  ;;  %v2449_v42 = vpop.f32.mrf.mxu0 }
 0x2b6   :  { %2540 = vst [vmem:[#allocation11 + $0xe0] sm:$0xff] %v2335_v23  ;;  %2542 = vst [vmem:[#allocation11 + $0xf0] sm:$0xff] %v2448_v18  ;;  %v2337_v27 = vadd.f32 %v2336_v19, %v4073_v13  ;;  %v2450_v29 = vadd.f32 %v2449_v42, %v4076_v9 }
 0x2b7   :  { %v2340_v57 = vpop.f32.mrf.mxu1  ;;  %v2453_v30 = vpop.f32.mrf.mxu0 }
 0x2b8   :  { %2541 = vst [vmem:[#allocation11 + $0xe8] sm:$0xff] %v2337_v27  ;;  %2543 = vst [vmem:[#allocation11 + $0xf8] sm:$0xff] %v2450_v29  ;;  %v2341_v10 = vadd.f32 %v2340_v57, %v4065_v34  ;;  %v2454_v37 = vadd.f32 %v2453_v30, %v4068_v63 }
 0x2b9   :  { %v2342_v31 = vpop.f32.mrf.mxu1  ;;  %v2455_v20 = vpop.f32.mrf.mxu0 }
 0x2ba   :  { %2548 = vst [vmem:[#allocation11 + $0x120] sm:$0xff] %v2341_v10  ;;  %2550 = vst [vmem:[#allocation11 + $0x130] sm:$0xff] %v2454_v37  ;;  %v2343_v32 = vadd.f32 %v2342_v31, %v4073_v13  ;;  %v2456_v6 = vadd.f32 %v2455_v20, %v4076_v9 }
 0x2bb   :  { %v2344_v22 = vpop.f32.mrf.mxu1  ;;  %v2457_v7 = vpop.f32.mrf.mxu0 }
 0x2bc   :  { %2549 = vst [vmem:[#allocation11 + $0x128] sm:$0xff] %v2343_v32  ;;  %2551 = vst [vmem:[#allocation11 + $0x138] sm:$0xff] %v2456_v6  ;;  %v2345_v15 = vadd.f32 %v2344_v22, %v4065_v34  ;;  %v2458_v2 = vadd.f32 %v2457_v7, %v4068_v63 }
 0x2bd   :  { %v2346_v36 = vpop.f32.mrf.mxu1  ;;  %v2459_v44 = vpop.f32.mrf.mxu0 }
 0x2be   :  { %2556 = vst [vmem:[#allocation11 + $0x160] sm:$0xff] %v2345_v15  ;;  %2558 = vst [vmem:[#allocation11 + $0x170] sm:$0xff] %v2458_v2  ;;  %v2347_v47 = vadd.f32 %v2346_v36, %v4073_v13  ;;  %v2460_v12 = vadd.f32 %v2459_v44, %v4076_v9 }
 0x2bf   :  { %v2350_v5 = vpop.f32.mrf.mxu1  ;;  %v2463_v14 = vpop.f32.mrf.mxu0 }
 0x2c0   :  { %2557 = vst [vmem:[#allocation11 + $0x168] sm:$0xff] %v2347_v47  ;;  %2559 = vst [vmem:[#allocation11 + $0x178] sm:$0xff] %v2460_v12  ;;  %v2351_v45 = vadd.f32 %v2350_v5, %v4065_v34  ;;  %v2464_v54 = vadd.f32 %v2463_v14, %v4068_v63 }
 0x2c1   :  { %v2352_v61 = vpop.f32.mrf.mxu1  ;;  %v2465_v24 = vpop.f32.mrf.mxu0 }
 0x2c2   :  { %2564 = vst [vmem:[#allocation11 + $0x1a0] sm:$0xff] %v2351_v45  ;;  %2566 = vst [vmem:[#allocation11 + $0x1b0] sm:$0xff] %v2464_v54  ;;  %v2353_v26 = vadd.f32 %v2352_v61, %v4073_v13  ;;  %v2466_v28 = vadd.f32 %v2465_v24, %v4076_v9 }
 0x2c3   :  { %v2354_v0 = vpop.f32.mrf.mxu1  ;;  %v2467_v38 = vpop.f32.mrf.mxu0 }
 0x2c4   :  { %2565 = vst [vmem:[#allocation11 + $0x1a8] sm:$0xff] %v2353_v26  ;;  %2567 = vst [vmem:[#allocation11 + $0x1b8] sm:$0xff] %v2466_v28  ;;  %v2355_v25 = vadd.f32 %v2354_v0, %v4065_v34  ;;  %v2468_v60 = vadd.f32 %v2467_v38, %v4068_v63 }
 0x2c5   :  { %v2356_v41 = vpop.f32.mrf.mxu1  ;;  %v2469_v56 = vpop.f32.mrf.mxu0 }
 0x2c6   :  { %2572 = vst [vmem:[#allocation11 + $0x1e0] sm:$0xff] %v2355_v25  ;;  %2574 = vst [vmem:[#allocation11 + $0x1f0] sm:$0xff] %v2468_v60  ;;  %v2357_v16 = vadd.f32 %v2356_v41, %v4073_v13  ;;  %v2470_v3 = vadd.f32 %v2469_v56, %v4076_v9 }
 0x2c7   :  { %v2360_v48 = vpop.f32.mrf.mxu1  ;;  %v2473_v40 = vpop.f32.mrf.mxu0 }
 0x2c8   :  { %2573 = vst [vmem:[#allocation11 + $0x1e8] sm:$0xff] %v2357_v16  ;;  %2575 = vst [vmem:[#allocation11 + $0x1f8] sm:$0xff] %v2470_v3  ;;  %v2361_v62 = vadd.f32 %v2360_v48, %v4065_v34  ;;  %v2474_v4 = vadd.f32 %v2473_v40, %v4068_v63 }
 0x2c9   :  { %v2362_v58 = vpop.f32.mrf.mxu1  ;;  %v2475_v52 = vpop.f32.mrf.mxu0 }
 0x2ca   :  { %2580 = vst [vmem:[#allocation11 + $0x220] sm:$0xff] %v2361_v62  ;;  %2582 = vst [vmem:[#allocation11 + $0x230] sm:$0xff] %v2474_v4  ;;  %v2363_v53 = vadd.f32 %v2362_v58, %v4073_v13  ;;  %v2476_v17 = vadd.f32 %v2475_v52, %v4076_v9 }
 0x2cb   :  { %v2364_v11 = vpop.f32.mrf.mxu1  ;;  %v2477_v35 = vpop.f32.mrf.mxu0 }
 0x2cc   :  { %2581 = vst [vmem:[#allocation11 + $0x228] sm:$0xff] %v2363_v53  ;;  %2583 = vst [vmem:[#allocation11 + $0x238] sm:$0xff] %v2476_v17  ;;  %v2365_v59 = vadd.f32 %v2364_v11, %v4065_v34  ;;  %v2478_v21 = vadd.f32 %v2477_v35, %v4068_v63 }
 0x2cd   :  { %v2366_v33 = vpop.f32.mrf.mxu1  ;;  %v2479_v46 = vpop.f32.mrf.mxu0 }
 0x2ce   :  { %2588 = vst [vmem:[#allocation11 + $0x260] sm:$0xff] %v2365_v59  ;;  %2590 = vst [vmem:[#allocation11 + $0x270] sm:$0xff] %v2478_v21  ;;  %v2367_v51 = vadd.f32 %v2366_v33, %v4073_v13  ;;  %v2480_v39 = vadd.f32 %v2479_v46, %v4076_v9 }
 0x2cf   :  { %v2370_v43 = vpop.f32.mrf.mxu1  ;;  %v2483_v50 = vpop.f32.mrf.mxu0 }
 0x2d0   :  { %2589 = vst [vmem:[#allocation11 + $0x268] sm:$0xff] %v2367_v51  ;;  %2591 = vst [vmem:[#allocation11 + $0x278] sm:$0xff] %v2480_v39  ;;  %v2371_v49 = vadd.f32 %v2370_v43, %v4065_v34  ;;  %v2484_v55 = vadd.f32 %v2483_v50, %v4068_v63 }
 0x2d1   :  { %v2372_v8 = vpop.f32.mrf.mxu1  ;;  %v2485_v1 = vpop.f32.mrf.mxu0 }
 0x2d2   :  { %2596 = vst [vmem:[#allocation11 + $0x2a0] sm:$0xff] %v2371_v49  ;;  %2598 = vst [vmem:[#allocation11 + $0x2b0] sm:$0xff] %v2484_v55  ;;  %v2373_v23 = vadd.f32 %v2372_v8, %v4073_v13  ;;  %v2486_v18 = vadd.f32 %v2485_v1, %v4076_v9 }
 0x2d3   :  { %v2374_v19 = vpop.f32.mrf.mxu1  ;;  %v2487_v42 = vpop.f32.mrf.mxu0 }
 0x2d4   :  { %2597 = vst [vmem:[#allocation11 + $0x2a8] sm:$0xff] %v2373_v23  ;;  %2599 = vst [vmem:[#allocation11 + $0x2b8] sm:$0xff] %v2486_v18  ;;  %v2375_v27 = vadd.f32 %v2374_v19, %v4065_v34  ;;  %v2488_v29 = vadd.f32 %v2487_v42, %v4068_v63 }
 0x2d5   :  { %v2376_v57 = vpop.f32.mrf.mxu1  ;;  %v2489_v30 = vpop.f32.mrf.mxu0 }
 0x2d6   :  { %2604 = vst [vmem:[#allocation11 + $0x2e0] sm:$0xff] %v2375_v27  ;;  %2606 = vst [vmem:[#allocation11 + $0x2f0] sm:$0xff] %v2488_v29  ;;  %v2377_v10 = vadd.f32 %v2376_v57, %v4073_v13  ;;  %v2490_v37 = vadd.f32 %v2489_v30, %v4076_v9 }
 0x2d7   :  { %v2380_v31 = vpop.f32.mrf.mxu1 }
 0x2d8   :  { %2605 = vst [vmem:[#allocation11 + $0x2e8] sm:$0xff] %v2377_v10  ;;  %2607 = vst [vmem:[#allocation11 + $0x2f8] sm:$0xff] %v2490_v37  ;;  %v2381_v20 = vadd.f32 %v2380_v31, %v4065_v34 }
 0x2d9   :  { %v2382_v32 = vpop.f32.mrf.mxu1 }
 0x2da   :  { %2612 = vst [vmem:[#allocation11 + $0x320] sm:$0xff] %v2381_v20  ;;  %v2383_v6 = vadd.f32 %v2382_v32, %v4073_v13 }
 0x2db   :  { %v2384_v22 = vpop.f32.mrf.mxu1 }
 0x2dc   :  { %2613 = vst [vmem:[#allocation11 + $0x328] sm:$0xff] %v2383_v6  ;;  %v2385_v7 = vadd.f32 %v2384_v22, %v4065_v34 }
 0x2dd   :  { %v2386_v15 = vpop.f32.mrf.mxu1 }
 0x2de   :  { %2620 = vst [vmem:[#allocation11 + $0x360] sm:$0xff] %v2385_v7  ;;  %v2387_v2 = vadd.f32 %v2386_v15, %v4073_v13 }
 0x2df   :  { %v2390_v36 = vpop.f32.mrf.mxu1 }
 0x2e0   :  { %2621 = vst [vmem:[#allocation11 + $0x368] sm:$0xff] %v2387_v2  ;;  %v2391_v44 = vadd.f32 %v2390_v36, %v4065_v34 }
 0x2e1   :  { %v2392_v47 = vpop.f32.mrf.mxu1 }
 0x2e2   :  { %2628 = vst [vmem:[#allocation11 + $0x3a0] sm:$0xff] %v2391_v44  ;;  %v2393_v12 = vadd.f32 %v2392_v47, %v4073_v13 }
 0x2e3   :  { %v2394_v5 = vpop.f32.mrf.mxu1 }
 0x2e4   :  { %2629 = vst [vmem:[#allocation11 + $0x3a8] sm:$0xff] %v2393_v12  ;;  %v2395_v14 = vadd.f32 %v2394_v5, %v4065_v34 }
 0x2e5   :  { %v2396_v45 = vpop.f32.mrf.mxu1 }
 0x2e6   :  { %2636 = vst [vmem:[#allocation11 + $0x3e0] sm:$0xff] %v2395_v14  ;;  %v2397_v54 = vadd.f32 %v2396_v45, %v4073_v13 }
 0x2e7   :  { %v2493_v61 = vpop.f32.mrf.mxu1 }
 0x2e8   :  { %2637 = vst [vmem:[#allocation11 + $0x3e8] sm:$0xff] %v2397_v54  ;;  %v2494_v24 = vadd.f32 %v2493_v61, %v4068_v63 }
 0x2e9   :  { %v2495_v26 = vpop.f32.mrf.mxu1 }
 0x2ea   :  { %2614 = vst [vmem:[#allocation11 + $0x330] sm:$0xff] %v2494_v24  ;;  %v2496_v28 = vadd.f32 %v2495_v26, %v4076_v9 }
 0x2eb   :  { %v2497_v0 = vpop.f32.mrf.mxu1 }
 0x2ec   :  { %2615 = vst [vmem:[#allocation11 + $0x338] sm:$0xff] %v2496_v28  ;;  %v2498_v38 = vadd.f32 %v2497_v0, %v4068_v63 }
 0x2ed   :  { %v2499_v25 = vpop.f32.mrf.mxu1 }
 0x2ee   :  { %2622 = vst [vmem:[#allocation11 + $0x370] sm:$0xff] %v2498_v38  ;;  %v2500_v34 = vadd.f32 %v2499_v25, %v4076_v9 }
 0x2ef   :  { %v2503_v60 = vpop.f32.mrf.mxu1 }
 0x2f0   :  { %2623 = vst [vmem:[#allocation11 + $0x378] sm:$0xff] %v2500_v34  ;;  %v2504_v13 = vadd.f32 %v2503_v60, %v4068_v63 }
 0x2f1   :  { %v2505_v41 = vpop.f32.mrf.mxu1 }
 0x2f2   :  { %2630 = vst [vmem:[#allocation11 + $0x3b0] sm:$0xff] %v2504_v13  ;;  %v2506_v56 = vadd.f32 %v2505_v41, %v4076_v9 }
 0x2f3   :  { %v2507_v16 = vpop.f32.mrf.mxu1 }
 0x2f4   :  { %2631 = vst [vmem:[#allocation11 + $0x3b8] sm:$0xff] %v2506_v56  ;;  %v2508_v3 = vadd.f32 %v2507_v16, %v4068_v63 }
 0x2f5   :  { %v2509_v48 = vpop.f32.mrf.mxu1 }
 0x2f6   :  { %2638 = vst [vmem:[#allocation11 + $0x3f0] sm:$0xff] %v2508_v3  ;;  %v2510_v40 = vadd.f32 %v2509_v48, %v4076_v9 }
 0x2f8   :  { %2639 = vst [vmem:[#allocation11 + $0x3f8] sm:$0xff] %v2510_v40 }
 0x2f9   :  { %3507 = shalt.err (!%p3504_p1)
}
 0x2fa   :  { %s3541_s30 = smov 1024  }
 0x2fb   :  { %2663 = dma.vmem_to_hbm [thread:$0]  %s2658_s28, 16384, %s4152_s6, [#allocation12], %s3541_s30, %s3541_s30, %s3527_s24  }
 0x2fc   :  { %3522 = dma.done.wait [#allocation4], 2048  }
 0x2fd   :  { %3523 = vsyncadd [#allocation4], 4294965248 }
 0x2fe   :  { %3524 = dma.done.wait [#allocation12], 16384  }
 0x2ff   :  { %3525 = vsyncadd [#allocation12], 4294950912 }
 0x300   :  { %2670 = vsyncpa [#allocation3], 1 }
 0x301   :  { %2671 = vsyncpa [#allocation6], 1 }
 0x302   :  { %2672 = vsyncpa [#allocation9], 1 }
 0x303   :  { %2673 = vsyncpa [#allocation4], 1 }
 0x304   :  { %2674 = vsyncpa [#allocation12], 1 }

</bundles_post_ra>
